<compile_context>
chip_gen: v7x
topology: tpu7x:2x2x1
jax: 0.10.0
libtpu: 0.0.40
codegen_flags: <defaults>
</compile_context>

<pallas_src>
import functools

import jax
import jax.numpy as jnp
from jax.experimental import pallas as pl
from jax.experimental.pallas import tpu as pltpu


# ---------------------------------------------------------------------------
# Pass 1: per-batch-tile partial BatchNorm statistics.
# Output block (1, C, 4) columns: [sum(mask), sum(mask^2), sum(x2), sum(x2^2)]
# with x2 = x @ W^T + b. Stats are summed across tiles outside the kernel.
# ---------------------------------------------------------------------------
def _geur_stats_kernel(x_ref, mask_ref, w_ref, b_ref, stats_ref):
    tb, c, d = x_ref.shape
    x = x_ref[...].astype(jnp.float32)          # (TB, C, D)
    mask = mask_ref[...].astype(jnp.float32)    # (TB, C, D)
    w = w_ref[...].astype(jnp.float32)          # (D, D), PyTorch (out, in) layout
    b = b_ref[...].astype(jnp.float32)          # (1, D)

    # 2-D MXU matmul: (TB*C, D) x (D, D)^T  (contract last dims, no transpose op).
    x2 = (jax.lax.dot_general(
        x.reshape(tb * c, d), w,
        dimension_numbers=(((1,), (1,)), ((), ())),
        preferred_element_type=jnp.float32,
    ) + b).reshape(tb, c, d)

    def sums(v):
        # Reduce the (cheap) leading tile axis first, then one lane reduce.
        s = jnp.sum(jnp.sum(v, axis=0), axis=1, keepdims=True)          # (C, 1)
        ss = jnp.sum(jnp.sum(v * v, axis=0), axis=1, keepdims=True)     # (C, 1)
        return s, ss

    s_m, ss_m = sums(mask)
    s_2, ss_2 = sums(x2)
    stats_ref[...] = jnp.concatenate([s_m, ss_m, s_2, ss_2], axis=1)[None]  # (1,C,4)


# ---------------------------------------------------------------------------
# Pass 2: matmul + folded BatchNorm affine + GLU gate + L2 normalize (dim=1).
# params_ref rows: [scale_bn1, scale_bn2, shift_bn1 + shift_bn2], each (C, 1).
# ---------------------------------------------------------------------------
def _geur_apply_kernel(x_ref, mask_ref, w_ref, b_ref, p_ref, o_ref):
    tb, c, d = x_ref.shape
    x = x_ref[...].astype(jnp.float32)
    mask = mask_ref[...].astype(jnp.float32)
    w = w_ref[...].astype(jnp.float32)
    b = b_ref[...].astype(jnp.float32)          # (1, D)
    p = p_ref[...]                              # (3, C, 1) float32

    s1 = p[0:1]                                 # (1, C, 1)  BN1 folded scale
    s2 = p[1:2]                                 # (1, C, 1)  BN2 folded scale
    sh = p[2:3]                                 # (1, C, 1)  BN1+BN2 folded shift

    x2 = (jax.lax.dot_general(
        x.reshape(tb * c, d), w,
        dimension_numbers=(((1,), (1,)), ((), ())),
        preferred_element_type=jnp.float32,
    ) + b).reshape(tb, c, d)

    # t = BN1(mask) + BN2(x2) with the affine folded into one FMA per tensor.
    t = s1 * mask + s2 * x2 + sh

    # GLU(cat(x, t), -1) == x * sigmoid(t)
    gated = x * jax.nn.sigmoid(t)

    # F.normalize (p=2, dim=1, eps=1e-12): rsqrt + multiply (EUP), no divide.
    sumsq = jnp.sum(gated * gated, axis=1, keepdims=True)       # (TB, 1, D)
    inv = jax.lax.rsqrt(jnp.maximum(sumsq, jnp.float32(1e-24)))
    o_ref[...] = (gated * inv).astype(o_ref.dtype)


def _pick_tile_b(B, C, D, max_block_bytes=2 * 1024 * 1024):
    """Largest divisor of B whose (TB, C, D) f32 block stays under the cap."""
    best = 1
    for tb in range(1, B + 1):
        if B % tb == 0 and tb * C * D * 4 <= max_block_bytes:
            best = tb
    return best


@functools.partial(jax.jit, static_argnames=("tile_b",))
def gated_embedding_unit_reasoning(x, mask, fc_weight, fc_bias,
                                   bn1_gamma, bn1_beta, bn2_gamma, bn2_beta,
                                   *, tile_b=None):
    """x, mask: (B, n_clips, D). fc_weight: (D, D) PyTorch layout (out, in)."""
    B, C, D = x.shape
    if tile_b is None:
        tile_b = _pick_tile_b(B, C, D)
    assert B % tile_b == 0, "tile_b must divide the batch dimension"
    num_bt = B // tile_b

    f32 = jnp.float32
    w = fc_weight.astype(f32)                   # (D, D), untransposed
    bias = fc_bias.astype(f32).reshape(1, D)

    blk_x = pl.BlockSpec((tile_b, C, D), lambda i: (i, 0, 0))
    blk_w = pl.BlockSpec((D, D), lambda i: (0, 0))        # grid-resident
    blk_b = pl.BlockSpec((1, D), lambda i: (0, 0))        # grid-resident
    cparams = pltpu.CompilerParams(
        dimension_semantics=("parallel",),
        vmem_limit_bytes=32 * 1024 * 1024,
    )

    # ---- pass 1: per-tile partial BN statistics ---------------------------
    partial = pl.pallas_call(
        _geur_stats_kernel,
        out_shape=jax.ShapeDtypeStruct((num_bt, C, 4), f32),
        grid=(num_bt,),
        in_specs=[blk_x, blk_x, blk_w, blk_b],
        out_specs=pl.BlockSpec((1, C, 4), lambda i: (i, 0, 0)),
        compiler_params=cparams,
    )(x, mask, w, bias)

    # ---- tiny cross-tile reduce + fold BN into per-channel scale/shift ----
    stats = jnp.sum(partial, axis=0)            # (C, 4)
    n = jnp.float32(B * D)                      # BN1d stats count per channel
    eps = jnp.float32(1e-5)

    def fold(s, ss, gamma, beta):
        mean = s / n
        var = jnp.maximum(ss / n - mean * mean, 0.0)     # one-pass, clamped
        scale = gamma.astype(f32) * jax.lax.rsqrt(var + eps)
        shift = beta.astype(f32) - mean * scale
        return scale, shift

    sc1, sh1 = fold(stats[:, 0], stats[:, 1], bn1_gamma, bn1_beta)
    sc2, sh2 = fold(stats[:, 2], stats[:, 3], bn2_gamma, bn2_beta)
    params = jnp.stack([sc1, sc2, sh1 + sh2]).reshape(3, C, 1).astype(f32)

    # ---- pass 2: apply ----------------------------------------------------
    out = pl.pallas_call(
        _geur_apply_kernel,
        out_shape=jax.ShapeDtypeStruct((B, C, D), f32),
        grid=(num_bt,),
        in_specs=[blk_x, blk_x, blk_w, blk_b,
                  pl.BlockSpec((3, C, 1), lambda i: (0, 0, 0))],
        out_specs=blk_x,
        compiler_params=cparams,
    )(x, mask, w, bias, params)
    return out


def _reference(x, mask, fc_weight, fc_bias, g1, b1, g2, b2):
    eps = 1e-5
    x2 = jnp.einsum('bcd,ed->bce', x, fc_weight) + fc_bias

    def bn(v, g, b):
        mean = jnp.mean(v, axis=(0, 2), keepdims=True)
        var = jnp.mean((v - mean) ** 2, axis=(0, 2), keepdims=True)
        return (v - mean) / jnp.sqrt(var + eps) * g.reshape(1, -1, 1) + b.reshape(1, -1, 1)

    t = bn(mask, g1, b1) + bn(x2, g2, b2)
    gated = x * jax.nn.sigmoid(t)
    nrm = jnp.sqrt(jnp.sum(gated ** 2, axis=1, keepdims=True))
    return gated / jnp.maximum(nrm, 1e-12)


if __name__ == "__main__":
    B, C, D = 8, 8, 256          # batch, n_clips, output_dimension
    key = jax.random.PRNGKey(0)
    kx, km, kw, kb, kg1, kb1, kg2, kb2 = jax.random.split(key, 8)

    x = jax.random.normal(kx, (B, C, D), dtype=jnp.float32)
    mask = jax.random.normal(km, (B, C, D), dtype=jnp.float32)

    # nn.Linear(D, D) init: U(-1/sqrt(D), 1/sqrt(D)) for weight and bias.
    k = 1.0 / (D ** 0.5)
    fc_weight = jax.random.uniform(kw, (D, D), minval=-k, maxval=k, dtype=jnp.float32)
    fc_bias = jax.random.uniform(kb, (D,), minval=-k, maxval=k, dtype=jnp.float32)

    # Non-trivial BN affine parameters to exercise the folded scale/shift path.
    bn1_gamma = 1.0 + 0.1 * jax.random.normal(kg1, (C,), dtype=jnp.float32)
    bn1_beta = 0.1 * jax.random.normal(kb1, (C,), dtype=jnp.float32)
    bn2_gamma = 1.0 + 0.1 * jax.random.normal(kg2, (C,), dtype=jnp.float32)
    bn2_beta = 0.1 * jax.random.normal(kb2, (C,), dtype=jnp.float32)

    # tile_b=4 -> grid of 2 batch tiles in each pass (exercises the tiling +
    # the cross-tile statistics reduction).
    out = gated_embedding_unit_reasoning(
        x, mask, fc_weight, fc_bias,
        bn1_gamma, bn1_beta, bn2_gamma, bn2_beta, tile_b=4)
    out = jax.block_until_ready(out)

    ref = _reference(x, mask, fc_weight, fc_bias,
                     bn1_gamma, bn1_beta, bn2_gamma, bn2_beta)
    assert out.shape == (B, C, D)
    assert bool(jnp.all(jnp.isfinite(out)))
    assert bool(jnp.allclose(out, ref, atol=5e-5, rtol=5e-5))

    print("KERNEL_OK")
</pallas_src>

<mosaic_0001>
module attributes {stable_mosaic.version = 11 : i64} {
  func.func @_geur_stats_kernel(%arg0: i32, %arg1: memref<4x8x256xf32, #tpu.memory_space<vmem>>, %arg2: memref<4x8x256xf32, #tpu.memory_space<vmem>>, %arg3: memref<256x256xf32, #tpu.memory_space<vmem>>, %arg4: memref<1x256xf32, #tpu.memory_space<vmem>>, %arg5: memref<1x8x4xf32, #tpu.memory_space<vmem>>) attributes {dimension_semantics = [#tpu.dimension_semantics<parallel>], iteration_bounds = array<i64: 2>, scalar_prefetch = 0 : i64, scratch_operands = 0 : i64, tpu.core_type = #tpu.core_type<tc>, window_params = [{transform_indices = @transform_0, window_bounds = array<i64: 4, 8, 256>}, {transform_indices = @transform_1, window_bounds = array<i64: 4, 8, 256>}, {pipeline_mode = #tpu.pipeline_mode<synchronous>, transform_indices = @transform_2, window_bounds = array<i64: 256, 256>}, {pipeline_mode = #tpu.pipeline_mode<synchronous>, transform_indices = @transform_3, window_bounds = array<i64: 1, 256>}, {transform_indices = @transform_4, window_bounds = array<i64: 1, 8, 4>}]} {
    %c0 = arith.constant 0 : index
    %c0_0 = arith.constant 0 : index
    %c0_1 = arith.constant 0 : index
    %0 = vector.load %arg1[%c0, %c0_0, %c0_1] : memref<4x8x256xf32, #tpu.memory_space<vmem>>, vector<4x8x256xf32>
    %c0_2 = arith.constant 0 : index
    %c0_3 = arith.constant 0 : index
    %c0_4 = arith.constant 0 : index
    %1 = vector.load %arg2[%c0_2, %c0_3, %c0_4] : memref<4x8x256xf32, #tpu.memory_space<vmem>>, vector<4x8x256xf32>
    %c0_5 = arith.constant 0 : index
    %c0_6 = arith.constant 0 : index
    %2 = vector.load %arg3[%c0_5, %c0_6] : memref<256x256xf32, #tpu.memory_space<vmem>>, vector<256x256xf32>
    %c0_7 = arith.constant 0 : index
    %c0_8 = arith.constant 0 : index
    %3 = vector.load %arg4[%c0_7, %c0_8] : memref<1x256xf32, #tpu.memory_space<vmem>>, vector<1x256xf32>
    %4 = vector.shape_cast %0 : vector<4x8x256xf32> to vector<32x256xf32>
    %cst = arith.constant dense<0.000000e+00> : vector<32x256xf32>
    %5 = tpu.matmul %4, %2, %cst {dimension_numbers = #tpu.dot_dimension_numbers<[1], [1], [0], [0], [0, 0, 1, 0], [], []>} : vector<32x256xf32>, vector<256x256xf32>, vector<32x256xf32> -> vector<32x256xf32>
    %6 = vector.broadcast %3 : vector<1x256xf32> to vector<32x256xf32>
    %7 = arith.addf %5, %6 : vector<32x256xf32>
    %8 = vector.shape_cast %7 : vector<32x256xf32> to vector<4x8x256xf32>
    %cst_9 = arith.constant dense<0.000000e+00> : vector<8x256xf32>
    %9 = vector.multi_reduction <add>, %1, %cst_9 [0] : vector<4x8x256xf32> to vector<8x256xf32>
    %cst_10 = arith.constant dense<0.000000e+00> : vector<8xf32>
    %10 = vector.multi_reduction <add>, %9, %cst_10 [1] : vector<8x256xf32> to vector<8xf32>
    %11 = vector.shape_cast %10 : vector<8xf32> to vector<8x1xf32>
    %12 = arith.mulf %1, %1 : vector<4x8x256xf32>
    %cst_11 = arith.constant dense<0.000000e+00> : vector<8x256xf32>
    %13 = vector.multi_reduction <add>, %12, %cst_11 [0] : vector<4x8x256xf32> to vector<8x256xf32>
    %cst_12 = arith.constant dense<0.000000e+00> : vector<8xf32>
    %14 = vector.multi_reduction <add>, %13, %cst_12 [1] : vector<8x256xf32> to vector<8xf32>
    %15 = vector.shape_cast %14 : vector<8xf32> to vector<8x1xf32>
    %cst_13 = arith.constant dense<0.000000e+00> : vector<8x256xf32>
    %16 = vector.multi_reduction <add>, %8, %cst_13 [0] : vector<4x8x256xf32> to vector<8x256xf32>
    %cst_14 = arith.constant dense<0.000000e+00> : vector<8xf32>
    %17 = vector.multi_reduction <add>, %16, %cst_14 [1] : vector<8x256xf32> to vector<8xf32>
    %18 = vector.shape_cast %17 : vector<8xf32> to vector<8x1xf32>
    %19 = arith.mulf %8, %8 : vector<4x8x256xf32>
    %cst_15 = arith.constant dense<0.000000e+00> : vector<8x256xf32>
    %20 = vector.multi_reduction <add>, %19, %cst_15 [0] : vector<4x8x256xf32> to vector<8x256xf32>
    %cst_16 = arith.constant dense<0.000000e+00> : vector<8xf32>
    %21 = vector.multi_reduction <add>, %20, %cst_16 [1] : vector<8x256xf32> to vector<8xf32>
    %22 = vector.shape_cast %21 : vector<8xf32> to vector<8x1xf32>
    %23 = tpu.concatenate %11, %15, %18, %22 in 1 : vector<8x1xf32>, vector<8x1xf32>, vector<8x1xf32>, vector<8x1xf32> -> vector<8x4xf32>
    %24 = vector.shape_cast %23 : vector<8x4xf32> to vector<1x8x4xf32>
    %c0_17 = arith.constant 0 : index
    %c0_18 = arith.constant 0 : index
    %c0_19 = arith.constant 0 : index
    %25 = vector.load %arg5[%c0_17, %c0_18, %c0_19] : memref<1x8x4xf32, #tpu.memory_space<vmem>>, vector<1x8x4xf32>
    tpu.vector_store %arg5[%c0_17, %c0_18, %c0_19], %24 {strides = array<i32>} : memref<1x8x4xf32, #tpu.memory_space<vmem>>, vector<1x8x4xf32>,
    return
  }
  func.func @transform_0(%arg0: i32) -> (i32, i32, i32) {
    %c0_i32 = arith.constant 0 : i32
    %c0_i32_0 = arith.constant 0 : i32
    %c0_i32_1 = arith.constant 0 : i32
    return %arg0, %c0_i32, %c0_i32_0 : i32, i32, i32
  }
  func.func @transform_1(%arg0: i32) -> (i32, i32, i32) {
    %c0_i32 = arith.constant 0 : i32
    %c0_i32_0 = arith.constant 0 : i32
    %c0_i32_1 = arith.constant 0 : i32
    return %arg0, %c0_i32, %c0_i32_0 : i32, i32, i32
  }
  func.func @transform_2(%arg0: i32) -> (i32, i32) {
    %c0_i32 = arith.constant 0 : i32
    %c0_i32_0 = arith.constant 0 : i32
    %c0_i32_1 = arith.constant 0 : i32
    return %c0_i32, %c0_i32_0 : i32, i32
  }
  func.func @transform_3(%arg0: i32) -> (i32, i32) {
    %c0_i32 = arith.constant 0 : i32
    %c0_i32_0 = arith.constant 0 : i32
    %c0_i32_1 = arith.constant 0 : i32
    return %c0_i32, %c0_i32_0 : i32, i32
  }
  func.func @transform_4(%arg0: i32) -> (i32, i32, i32) {
    %c0_i32 = arith.constant 0 : i32
    %c0_i32_0 = arith.constant 0 : i32
    %c0_i32_1 = arith.constant 0 : i32
    return %arg0, %c0_i32, %c0_i32_0 : i32, i32, i32
  }
}

module attributes {stable_mosaic.version = 11 : i64} {
  func.func @_geur_apply_kernel(%arg0: i32, %arg1: memref<4x8x256xf32, #tpu.memory_space<vmem>>, %arg2: memref<4x8x256xf32, #tpu.memory_space<vmem>>, %arg3: memref<256x256xf32, #tpu.memory_space<vmem>>, %arg4: memref<1x256xf32, #tpu.memory_space<vmem>>, %arg5: memref<3x8x1xf32, #tpu.memory_space<vmem>>, %arg6: memref<4x8x256xf32, #tpu.memory_space<vmem>>) attributes {dimension_semantics = [#tpu.dimension_semantics<parallel>], iteration_bounds = array<i64: 2>, scalar_prefetch = 0 : i64, scratch_operands = 0 : i64, tpu.core_type = #tpu.core_type<tc>, window_params = [{transform_indices = @transform_0, window_bounds = array<i64: 4, 8, 256>}, {transform_indices = @transform_1, window_bounds = array<i64: 4, 8, 256>}, {pipeline_mode = #tpu.pipeline_mode<synchronous>, transform_indices = @transform_2, window_bounds = array<i64: 256, 256>}, {pipeline_mode = #tpu.pipeline_mode<synchronous>, transform_indices = @transform_3, window_bounds = array<i64: 1, 256>}, {pipeline_mode = #tpu.pipeline_mode<synchronous>, transform_indices = @transform_4, window_bounds = array<i64: 3, 8, 1>}, {transform_indices = @transform_5, window_bounds = array<i64: 4, 8, 256>}]} {
    %c0 = arith.constant 0 : index
    %c0_0 = arith.constant 0 : index
    %c0_1 = arith.constant 0 : index
    %0 = vector.load %arg1[%c0, %c0_0, %c0_1] : memref<4x8x256xf32, #tpu.memory_space<vmem>>, vector<4x8x256xf32>
    %c0_2 = arith.constant 0 : index
    %c0_3 = arith.constant 0 : index
    %c0_4 = arith.constant 0 : index
    %1 = vector.load %arg2[%c0_2, %c0_3, %c0_4] : memref<4x8x256xf32, #tpu.memory_space<vmem>>, vector<4x8x256xf32>
    %c0_5 = arith.constant 0 : index
    %c0_6 = arith.constant 0 : index
    %2 = vector.load %arg3[%c0_5, %c0_6] : memref<256x256xf32, #tpu.memory_space<vmem>>, vector<256x256xf32>
    %c0_7 = arith.constant 0 : index
    %c0_8 = arith.constant 0 : index
    %3 = vector.load %arg4[%c0_7, %c0_8] : memref<1x256xf32, #tpu.memory_space<vmem>>, vector<1x256xf32>
    %c0_9 = arith.constant 0 : index
    %c0_10 = arith.constant 0 : index
    %c0_11 = arith.constant 0 : index
    %4 = vector.load %arg5[%c0_9, %c0_10, %c0_11] : memref<3x8x1xf32, #tpu.memory_space<vmem>>, vector<3x8x1xf32>
    %5 = vector.extract_strided_slice %4 {offsets = [0, 0, 0], sizes = [1, 8, 1], strides = [1, 1, 1]} : vector<3x8x1xf32> to vector<1x8x1xf32>
    %6 = vector.extract_strided_slice %4 {offsets = [1, 0, 0], sizes = [1, 8, 1], strides = [1, 1, 1]} : vector<3x8x1xf32> to vector<1x8x1xf32>
    %7 = vector.extract_strided_slice %4 {offsets = [2, 0, 0], sizes = [1, 8, 1], strides = [1, 1, 1]} : vector<3x8x1xf32> to vector<1x8x1xf32>
    %8 = vector.shape_cast %0 : vector<4x8x256xf32> to vector<32x256xf32>
    %cst = arith.constant dense<0.000000e+00> : vector<32x256xf32>
    %9 = tpu.matmul %8, %2, %cst {dimension_numbers = #tpu.dot_dimension_numbers<[1], [1], [0], [0], [0, 0, 1, 0], [], []>} : vector<32x256xf32>, vector<256x256xf32>, vector<32x256xf32> -> vector<32x256xf32>
    %10 = vector.broadcast %3 : vector<1x256xf32> to vector<32x256xf32>
    %11 = arith.addf %9, %10 : vector<32x256xf32>
    %12 = vector.shape_cast %11 : vector<32x256xf32> to vector<4x8x256xf32>
    %13 = vector.broadcast %5 : vector<1x8x1xf32> to vector<4x8x256xf32>
    %14 = arith.mulf %13, %1 : vector<4x8x256xf32>
    %15 = vector.broadcast %6 : vector<1x8x1xf32> to vector<4x8x256xf32>
    %16 = arith.mulf %15, %12 : vector<4x8x256xf32>
    %17 = arith.addf %14, %16 : vector<4x8x256xf32>
    %18 = vector.broadcast %7 : vector<1x8x1xf32> to vector<4x8x256xf32>
    %19 = arith.addf %17, %18 : vector<4x8x256xf32>
    %20 = arith.negf %19 : vector<4x8x256xf32>
    %21 = math.exp %20 : vector<4x8x256xf32>
    %cst_12 = arith.constant 1.000000e+00 : f32
    %22 = vector.broadcast %cst_12 : f32 to vector<4x8x256xf32>
    %23 = arith.addf %22, %21 : vector<4x8x256xf32>
    %24 = arith.divf %22, %23 : vector<4x8x256xf32>
    %25 = arith.mulf %0, %24 : vector<4x8x256xf32>
    %26 = arith.mulf %25, %25 : vector<4x8x256xf32>
    %cst_13 = arith.constant dense<0.000000e+00> : vector<4x256xf32>
    %27 = vector.multi_reduction <add>, %26, %cst_13 [1] : vector<4x8x256xf32> to vector<4x256xf32>
    %28 = vector.shape_cast %27 : vector<4x256xf32> to vector<4x1x256xf32>
    %cst_14 = arith.constant 1.000000e-24 : f32
    %29 = vector.broadcast %cst_14 : f32 to vector<4x1x256xf32>
    %30 = arith.maximumf %28, %29 : vector<4x1x256xf32>
    %31 = math.rsqrt %30 : vector<4x1x256xf32>
    %32 = vector.broadcast %31 : vector<4x1x256xf32> to vector<4x8x256xf32>
    %33 = arith.mulf %25, %32 : vector<4x8x256xf32>
    %c0_15 = arith.constant 0 : index
    %c0_16 = arith.constant 0 : index
    %c0_17 = arith.constant 0 : index
    %34 = vector.load %arg6[%c0_15, %c0_16, %c0_17] : memref<4x8x256xf32, #tpu.memory_space<vmem>>, vector<4x8x256xf32>
    tpu.vector_store %arg6[%c0_15, %c0_16, %c0_17], %33 {strides = array<i32>} : memref<4x8x256xf32, #tpu.memory_space<vmem>>, vector<4x8x256xf32>,
    return
  }
  func.func @transform_0(%arg0: i32) -> (i32, i32, i32) {
    %c0_i32 = arith.constant 0 : i32
    %c0_i32_0 = arith.constant 0 : i32
    %c0_i32_1 = arith.constant 0 : i32
    return %arg0, %c0_i32, %c0_i32_0 : i32, i32, i32
  }
  func.func @transform_1(%arg0: i32) -> (i32, i32, i32) {
    %c0_i32 = arith.constant 0 : i32
    %c0_i32_0 = arith.constant 0 : i32
    %c0_i32_1 = arith.constant 0 : i32
    return %arg0, %c0_i32, %c0_i32_0 : i32, i32, i32
  }
  func.func @transform_2(%arg0: i32) -> (i32, i32) {
    %c0_i32 = arith.constant 0 : i32
    %c0_i32_0 = arith.constant 0 : i32
    %c0_i32_1 = arith.constant 0 : i32
    return %c0_i32, %c0_i32_0 : i32, i32
  }
  func.func @transform_3(%arg0: i32) -> (i32, i32) {
    %c0_i32 = arith.constant 0 : i32
    %c0_i32_0 = arith.constant 0 : i32
    %c0_i32_1 = arith.constant 0 : i32
    return %c0_i32, %c0_i32_0 : i32, i32
  }
  func.func @transform_4(%arg0: i32) -> (i32, i32, i32) {
    %c0_i32 = arith.constant 0 : i32
    %c0_i32_0 = arith.constant 0 : i32
    %c0_i32_1 = arith.constant 0 : i32
    %c0_i32_2 = arith.constant 0 : i32
    return %c0_i32, %c0_i32_0, %c0_i32_1 : i32, i32, i32
  }
  func.func @transform_5(%arg0: i32) -> (i32, i32, i32) {
    %c0_i32 = arith.constant 0 : i32
    %c0_i32_0 = arith.constant 0 : i32
    %c0_i32_1 = arith.constant 0 : i32
    return %arg0, %c0_i32, %c0_i32_0 : i32, i32, i32
  }
}

</mosaic_0001>

<bundles_post_ra>
// kernel: gated_embedding_unit_reasoning.2
= control target key start
LH: loop header
LB: loop body
LE: loop exit
PB: predicated region body
PF: predicated region fallthrough
CT: control target
= control target key end

     0   :  { %9 = vsyncpa [#allocation3], 0  ;;  %s1269_s0 = inlined_call_operand.hbm [shape: f32[8,8,256], index: 0, kind: input, shape index: {}]   ;;  %s1270_s1 = inlined_call_operand.hbm [shape: f32[8,8,256], index: 1, kind: input, shape index: {}]   ;;  %s1271_s2 = inlined_call_operand.hbm [shape: f32[256,256], index: 2, kind: input, shape index: {}]   ;;  %s1272_s3 = inlined_call_operand.hbm [shape: f32[1,256], index: 3, kind: input, shape index: {}]   ;;  %s1273_s4 = inlined_call_operand.vmem [shape: f32[2,8,4], index: 4, kind: output, shape index: {}]  }
   0x1   :  { %11 = vsyncpa [#allocation3 + $0x1], 0 }
   0x2   :  { %12 = vsyncpa [#allocation5], 0 }
   0x3   :  { %14 = vsyncpa [#allocation5 + $0x1], 0 }
   0x4   :  { %15 = vsyncpa [#allocation8], 0  ;;  %s1018_s15 = smov 0   ;;  %s1020_s16 = smov 0  }
   0x5   :  { %s1022_s17 = smov 0   ;;  %s1024_s18 = smov 0  }
   0x6 LB: > { %s1037_s19 = sadd.s32 4294967295, %s985_s18   ;;  %p41_p0 = scmp.ne.s32.totalorder %s977_s16, %s973_s15  ;;  %s985_s18 = sphi %s1024_s18, %s1290_s18   ;;  %s981_s17 = sphi %s1022_s17, %s1289_s17   ;;  %s977_s16 = sphi %s1020_s16, %s1288_s16   ;;  %s973_s15 = sphi %s1018_s15, %s1287_s15  }
   0x7   : > { %p1274_p1 = scmp.eq.s32.totalorder %s1037_s19, 0  ;;  %p636_p2 = scmp.ge.s32.totalorder %s985_s18, 1 }
   0x8   : > { %p146_p3 = scmp.lt.s32.totalorder %s985_s18, 3  ;;  %s987_s22 = smov [#allocation6]  }
   0x9   : > { %p1045_p4 = por %p1274_p1, %p41_p0  ;;  %s158_s23 = sshll.u32 %s987_s22, 4  ;;  %s159_s23 = int_to_ptr.vmem [resolvable:$true] %s158_s23 }
   0xa   : > { %p1049_p5 = pnand %p636_p2, %p146_p3  ;;  %s988_s25 = smov [#allocation7]  }
   0xb   : > { %s1277_s20 = scalar_select %p1045_p4, 1, 0 }
   0xc   : > { %s1278_s21 = scalar_select %p1049_p5, 1, 0 }
   0xd   : > { %p768_p6 = pneg %p1049_p5  ;;  %s172_s26 = sshll.u32 %s988_s25, 4  ;;  %s1061_s26 = int_to_ptr.vmem [resolvable:$true] %s172_s26 }
   0xe   : > { %s823_s29 = scalar_lea.hbm %s1271_s2, 8192 }
   0xf   : > { %p1057_p7 = pnand %p768_p6, %p1274_p1  ;;  %p824_p8 = scmp.ne.s32.totalorder %s1271_s2, %s823_s29 }
  0x10   : > { %p830_p12 = scmp.lt.u32.totalorder %s823_s29, %s1271_s2 }
  0x11   : > { %p825_p9 = pneg %p1057_p7 }
  0x13   : > { %p826_p10 = pnand %p825_p9, %p824_p8 }
  0x15   : > { %p827_p11 = pneg %p826_p10 }
  0x17   : > { %p832_p13 = pnand %p830_p12, %p827_p11 }
  0x19   : > { %835 = shalt.err (!%p832_p13)
}
  0x1a   : > { %s836_s8 = scalar_lea.vmem %s159_s23, 8192  ;;  %p844_p6 = scmp.lt.s32.totalorder %s159_s23, %s159_s23 }
  0x1b   : > { %p837_p0 = scmp.ne.s32.totalorder %s159_s23, %s836_s8  ;;  %p845_p1 = scmp.lt.s32.totalorder %s836_s8, %s836_s8 }
  0x1d   : > { %p839_p2 = pnand %p837_p0, %p825_p9  ;;  %p846_p4 = por %p845_p1, %p844_p6 }
  0x1f   : > { %p840_p3 = pneg %p839_p2 }
  0x21   : > { %p847_p5 = pnand %p846_p4, %p840_p3 }
  0x23   : > { %850 = shalt.err (!%p847_p5)
}
  0x24   : > { %s989_s9 = smov 256   ;;  %s990_s10 = smov 16  }
  0x25   : > { %771 = dma.hbm_to_vmem [thread:$0]  (!%p1057_p7), %s1271_s2, 8192, %s159_s23, [#allocation5], %s989_s9, %s989_s9, %s990_s10  }
  0x26   : > { %s851_s15 = scalar_lea.hbm %s1272_s3, 32 }
  0x27   : > { %p852_p1 = scmp.ne.s32.totalorder %s1272_s3, %s851_s15  ;;  %p858_p8 = scmp.lt.u32.totalorder %s851_s15, %s1272_s3 }
  0x29   : > { %p854_p4 = pnand %p852_p1, %p825_p9 }
  0x2b   : > { %p855_p5 = pneg %p854_p4 }
  0x2d   : > { %p860_p10 = pnand %p858_p8, %p855_p5 }
  0x2f   : > { %863 = shalt.err (!%p860_p10)
}
  0x30   : > { %s864_s23 = scalar_lea.vmem %s1061_s26, 32  ;;  %p872_p0 = scmp.lt.s32.totalorder %s1061_s26, %s1061_s26 }
  0x31   : > { %p865_p11 = scmp.ne.s32.totalorder %s1061_s26, %s864_s23  ;;  %p873_p2 = scmp.lt.s32.totalorder %s864_s23, %s864_s23 }
  0x33   : > { %p867_p12 = pnand %p865_p11, %p825_p9  ;;  %p874_p3 = por %p873_p2, %p872_p0 }
  0x35   : > { %p868_p13 = pneg %p867_p12 }
  0x37   : > { %p875_p6 = pnand %p874_p3, %p868_p13 }
  0x39   : > { %878 = shalt.err (!%p875_p6)
}
  0x3a   : > { %774 = dma.hbm_to_vmem [thread:$0]  (!%p1057_p7), %s1272_s3, 32, %s1061_s26, [#allocation8]  }
  0x3b   : > { %s1114_s5 = sadd.s32 1, %s985_s18   ;;  %s28_s6 = sadd.s32 1, %s981_s17 }
  0x3c   : > { %s25_s24 = ssub.s32 %s985_s18, %s1114_s5  ;;  %p35_p9 = scmp.ne.s32.totalorder %s981_s17, %s977_s16 }
  0x3d   : > { %p26_p1 = scmp.eq.s32.totalorder %s25_s24, 0  ;;  %p36_p4 = scmp.eq.s32.totalorder %s985_s18, 0 }
  0x3e   : > { %p784_p5 = scmp.lt.s32.totalorder %s985_s18, 2  ;;  %s183_s7 = sand.u32 1, %s981_s17  }
  0x3f   : > { %s1125_s8 = scalar_select %p26_p1, %s981_s17, %s28_s6  }
  0x40   : > { %p37_p8 = por %p36_p4, %p35_p9  ;;  %s1127_s11 = sshll.u32 %s183_s7, 6 }
  0x41   : > { %s657_s12 = sshll.u32 %s985_s18, 10  ;;  %s187_s15 = scalar_lea.vmem [#allocation2], %s1127_s11 }
  0x42   : > { %s1133_s26 = scalar_lea.hbm %s1269_s0, %s657_s12  ;;  %s195_s22 = sshll.u32 %s187_s15, 4  ;;  %s1140_s22 = int_to_ptr.vmem [resolvable:$true] %s195_s22 }
  0x43   : > { %p1136_p7 = pnand %p784_p5, %p37_p8  ;;  %s1145_s23 = scalar_lea.hbm %s1270_s1, %s657_s12 }
  0x44   : > { %s1147_s29 = scalar_lea.sflag [#allocation3], %s183_s7  ;;  %s879_s30 = scalar_lea.hbm %s1133_s26, 1024 }
  0x45   : > { %p880_p10 = scmp.ne.s32.totalorder %s1133_s26, %s879_s30  ;;  %p881_p11 = pneg %p1136_p7 }
  0x46   : > { %s884_s13 = scalar_lea.hbm %s1269_s0, 2048  ;;  %p885_p0 = scmp.lt.u32.totalorder %s1133_s26, %s1269_s0 }
  0x47   : > { %p882_p12 = pnand %p881_p11, %p880_p10  ;;  %p886_p2 = scmp.lt.u32.totalorder %s884_s13, %s879_s30 }
  0x48   : > { %p888_p6 = scmp.lt.u32.totalorder %s879_s30, %s1133_s26 }
  0x49   : > { %p883_p13 = pneg %p882_p12  ;;  %p887_p3 = por %p886_p2, %p885_p0 }
  0x4b   : > { %p889_p9 = por %p888_p6, %p887_p3 }
  0x4d   : > { %p890_p1 = pnand %p889_p9, %p883_p13 }
  0x4f   : > { %893 = shalt.err (!%p890_p1)
}
  0x50   : > { %s894_s7 = scalar_lea.vmem %s1140_s22, 1024  ;;  %s991_s12 = smov [#allocation2]  }
  0x51   : > { %p895_p4 = scmp.ne.s32.totalorder %s1140_s22, %s894_s7  ;;  %s899_s27 = sshll.u32 %s991_s12, 4  ;;  %s900_s27 = int_to_ptr.vmem [resolvable:$false] %s899_s27 }
  0x52   : > { %s901_s28 = scalar_lea.vmem %s900_s27, 2048  ;;  %p902_p10 = scmp.lt.s32.totalorder %s1140_s22, %s900_s27 }
  0x53   : > { %p897_p5 = pnand %p895_p4, %p881_p11  ;;  %p903_p12 = scmp.lt.s32.totalorder %s901_s28, %s894_s7 }
  0x55   : > { %p898_p8 = pneg %p897_p5  ;;  %p904_p0 = por %p903_p12, %p902_p10 }
  0x57   : > { %p905_p2 = pnand %p904_p0, %p898_p8 }
  0x59   : > { %908 = shalt.err (!%p905_p2)
}
  0x5a   : > { %778 = dma.hbm_to_vmem [thread:$0]  (!%p1136_p7), %s1133_s26, 1024, %s1140_s22, %s1147_s29, %s989_s9, %s989_s9, %s990_s10  }
  0x5b   : > { %s209_s30 = scalar_lea.vmem [#allocation4], %s1127_s11  ;;  %s205_s24 = sand.u32 1, %s985_s18  }
  0x5c   : > { %s217_s6 = sshll.u32 %s209_s30, 4  ;;  %s1182_s13 = scalar_lea.sflag [#allocation5], %s205_s24  ;;  %s1180_s6 = int_to_ptr.vmem [resolvable:$true] %s217_s6 }
  0x5d   : > { %s909_s14 = scalar_lea.hbm %s1145_s23, 1024  ;;  %s914_s12 = scalar_lea.hbm %s1270_s1, 2048 }
  0x5e   : > { %p910_p13 = scmp.ne.s32.totalorder %s1145_s23, %s909_s14  ;;  %p915_p9 = scmp.lt.u32.totalorder %s1145_s23, %s1270_s1 }
  0x5f   : > { %p916_p1 = scmp.lt.u32.totalorder %s914_s12, %s909_s14  ;;  %p918_p5 = scmp.lt.u32.totalorder %s909_s14, %s1145_s23 }
  0x60   : > { %p912_p3 = pnand %p910_p13, %p881_p11 }
  0x61   : > { %p917_p4 = por %p916_p1, %p915_p9 }
  0x62   : > { %p913_p6 = pneg %p912_p3 }
  0x63   : > { %p919_p8 = por %p918_p5, %p917_p4 }
  0x65   : > { %p920_p10 = pnand %p919_p8, %p913_p6 }
  0x67   : > { %923 = shalt.err (!%p920_p10)
}
  0x68   : > { %s924_s18 = scalar_lea.vmem %s1180_s6, 1024  ;;  %s992_s11 = smov [#allocation4]  }
  0x69   : > { %p925_p12 = scmp.ne.s32.totalorder %s1180_s6, %s924_s18  ;;  %s929_s26 = sshll.u32 %s992_s11, 4  ;;  %s930_s26 = int_to_ptr.vmem [resolvable:$false] %s929_s26 }
  0x6a   : > { %s931_s22 = scalar_lea.vmem %s930_s26, 2048  ;;  %p932_p13 = scmp.lt.s32.totalorder %s1180_s6, %s930_s26 }
  0x6b   : > { %p927_p0 = pnand %p925_p12, %p881_p11  ;;  %p933_p3 = scmp.lt.s32.totalorder %s931_s22, %s924_s18 }
  0x6d   : > { %p928_p2 = pneg %p927_p0  ;;  %p934_p9 = por %p933_p3, %p932_p13 }
  0x6f   : > { %p935_p1 = pnand %p934_p9, %p928_p2 }
  0x71   : > { %938 = shalt.err (!%p935_p1)
}
  0x72   : > { %781 = dma.hbm_to_vmem [thread:$0]  (!%p1136_p7), %s1145_s23, 1024, %s1180_s6, %s1182_s13, %s989_s9, %s989_s9, %s990_s10  }
  0x73   : > { %p1281_p11 = scmp.ne.s32.totalorder %s1278_s21, 0 }
  0x74   : > { %s231_s29 = sand.u32 (!%p1281_p11), 1, %s977_s16   ;;  %p1282_p6 = scmp.ne.s32.totalorder (!%p1281_p11), %s1277_s20, 0 }
  0x75   : > { %229 = sbr.rel (%p1281_p11) target bundleno = 641 (0x281), region = 36  ;;  %s649_s30 = sshll.u32 (!%p1281_p11), %s231_s29, 6 }
  0x76   : > { %s232_s24 = scalar_lea.sflag (!%p1281_p11), [#allocation3], %s231_s29  ;;  %s1214_s14 = scalar_lea.vmem (!%p1281_p11), [#allocation2], %s649_s30 }
  0x7c   : > { %956 = dma.done.wait (%p1282_p6), %s232_s24, 1024  }
  0x7d   : > { %958 = vsyncadd (%p1282_p6), %s232_s24, 4294966272  ;;  %s240_s25 = sand.u32 1, %s1037_s19   ;;  %s1221_s9 = scalar_lea.vmem [#allocation4], %s649_s30 }
  0x7e   : > { %s241_s15 = scalar_lea.sflag [#allocation5], %s240_s25 }
  0x7f   : > { %960 = dma.done.wait (%p1282_p6), %s241_s15, 1024  }
  0x80   : > { %962 = vsyncadd (%p1282_p6), %s241_s15, 4294966272  ;;  %p1283_p7 = scmp.eq.s32.totalorder %s1037_s19, 0 }
  0x82   : > { %964 = dma.done.wait (%p1283_p7), [#allocation5], 8192   ;;  %p1284_p4 = pmov %p1283_p7 }
  0x84   : > { %966 = vsyncadd (%p1284_p4), [#allocation5], 4294959104  ;;  %p1285_p5 = pmov %p1284_p4 }
  0x85   : > { %p1286_p8 = pmov %p1284_p4 }
  0x86   : > { %968 = dma.done.wait (%p1285_p5), [#allocation8], 32  }
  0x87   : > { %970 = vsyncadd (%p1286_p8), [#allocation8], 4294967264  ;;  %v304_v0 = vld [vmem:[#allocation6 + $0x8] sm:$0xff]  ;;  %v306_v1 = vld [vmem:[#allocation6 + $0x18] sm:$0xff]  ;;  %p283_p10 = scmp.lt.s32.totalorder %s1037_s19, 1  ;;  %vm520_vm0 = vcmask 7168  }
  0x88   : > { %v303_v2 = vld [vmem:[#allocation6] sm:$0xff]  ;;  %v660_v3 = vpack.c.bf16 %v306_v1, %v304_v0  ;;  %v305_v4 = vld [vmem:[#allocation6 + $0x10] sm:$0xff]  ;;  %v308_v5 = vld [vmem:[#allocation6 + $0x28] sm:$0xff]  ;;  %vm522_vm1 = vcmask 15360   ;;  %vm524_vm2 = vcmask 23552   ;;  %vm526_vm3 = vcmask 31744  }
  0x89   : > { %v310_v6 = vld [vmem:[#allocation6 + $0x38] sm:$0xff]  ;;  %v662_v7 = vpack.c.bf16 %v305_v4, %v303_v2  ;;  %v307_v9 = vld [vmem:[#allocation6 + $0x20] sm:$0xff]  ;;  %v309_v10 = vld [vmem:[#allocation6 + $0x30] sm:$0xff]  ;;  %s1292_s19 = smov (!%p283_p10, %s1037_s19), 1 }
  0x8a   : > { %v664_v8 = vpack.c.bf16 %v310_v6, %v308_v5  ;;  %661 = vmatprep.subr.bf16.mxu0 %v660_v3  ;;  %724 = vmatprep.subr.bf16.mxu1 %v660_v3  ;;  %v312_v11 = vld [vmem:[#allocation6 + $0x48] sm:$0xff]  ;;  %v314_v12 = vld [vmem:[#allocation6 + $0x58] sm:$0xff]  ;;  %v666_v13 = vpack.c.bf16 %v309_v10, %v307_v9  ;;  %v311_v15 = vld [vmem:[#allocation6 + $0x40] sm:$0xff]  ;;  %s653_s20 = sshll.u32 %s1292_s19, 3 }
  0x8b   : > { %663 = vmatpush1.bf16.xpose.msra.mxu0 %v662_v7  ;;  %740 = vmatpush1.bf16.xpose.msra.mxu1 %v662_v7  ;;  %v668_v14 = vpack.c.bf16 %v314_v12, %v312_v11  ;;  %v313_v16 = vld [vmem:[#allocation6 + $0x50] sm:$0xff]  ;;  %v316_v17 = vld [vmem:[#allocation6 + $0x68] sm:$0xff]  ;;  %v318_v18 = vld [vmem:[#allocation6 + $0x78] sm:$0xff]  ;;  %s286_s23 = scalar_lea.vmem %s1273_s4, %s653_s20 }
  0x8c   : > { %665 = vmatprep.subr.bf16.mxu0 %v664_v8  ;;  %725 = vmatprep.subr.bf16.mxu1 %v664_v8  ;;  %v670_v19 = vpack.c.bf16 %v313_v16, %v311_v15  ;;  %v672_v20 = vpack.c.bf16 %v318_v18, %v316_v17  ;;  %v315_v21 = vld [vmem:[#allocation6 + $0x60] sm:$0xff]  ;;  %v317_v22 = vld [vmem:[#allocation6 + $0x70] sm:$0xff]  ;;  %v288_v23 = vld [vmem:[%s1214_s14 + $0x8] sm:$0xff] }
  0x8d   : > { %v320_v24 = vld [vmem:[#allocation6 + $0x88] sm:$0xff]  ;;  %v322_v25 = vld [vmem:[#allocation6 + $0x98] sm:$0xff]  ;;  %443 = vmatprep.mubr.f32.mxu0 %v288_v23  ;;  %v674_v27 = vpack.c.bf16 %v317_v22, %v315_v21  ;;  %v319_v29 = vld [vmem:[#allocation6 + $0x80] sm:$0xff] }
  0x8e   : > { %v292_v26 = vld [vmem:[%s1214_s14 + $0x28] sm:$0xff]  ;;  %v676_v28 = vpack.c.bf16 %v322_v25, %v320_v24  ;;  %v321_v30 = vld [vmem:[#allocation6 + $0x90] sm:$0xff]  ;;  %v326_v32 = vld [vmem:[#allocation6 + $0xb8] sm:$0xff] }
  0x8f   : > { %455 = vmatprep.mubr.f32.mxu1 %v292_v26  ;;  %v324_v31 = vld [vmem:[#allocation6 + $0xa8] sm:$0xff]  ;;  %v678_v33 = vpack.c.bf16 %v321_v30, %v319_v29  ;;  %v323_v35 = vld [vmem:[#allocation6 + $0xa0] sm:$0xff]  ;;  %v325_v36 = vld [vmem:[#allocation6 + $0xb0] sm:$0xff] }
  0x90   : > { %v680_v34 = vpack.c.bf16 %v326_v32, %v324_v31  ;;  %v328_v37 = vld [vmem:[#allocation6 + $0xc8] sm:$0xff]  ;;  %v330_v38 = vld [vmem:[#allocation6 + $0xd8] sm:$0xff]  ;;  %v682_v39 = vpack.c.bf16 %v325_v36, %v323_v35  ;;  %v327_v41 = vld [vmem:[#allocation6 + $0xc0] sm:$0xff] }
  0x91   : > { %v684_v40 = vpack.c.bf16 %v330_v38, %v328_v37  ;;  %v329_v42 = vld [vmem:[#allocation6 + $0xd0] sm:$0xff]  ;;  %v332_v43 = vld [vmem:[#allocation6 + $0xe8] sm:$0xff]  ;;  %v334_v44 = vld [vmem:[#allocation6 + $0xf8] sm:$0xff] }
  0x92   : > { %v686_v45 = vpack.c.bf16 %v329_v42, %v327_v41  ;;  %v688_v46 = vpack.c.bf16 %v334_v44, %v332_v43  ;;  %v331_v47 = vld [vmem:[#allocation6 + $0xe0] sm:$0xff]  ;;  %v333_v48 = vld [vmem:[#allocation6 + $0xf0] sm:$0xff]  ;;  %v336_v49 = vld [vmem:[#allocation6 + $0x108] sm:$0xff] }
  0x93   : > { %667 = vmatpush1.bf16.xpose.msra.mxu0 %v666_v13  ;;  %741 = vmatpush1.bf16.xpose.msra.mxu1 %v666_v13  ;;  %v338_v50 = vld [vmem:[#allocation6 + $0x118] sm:$0xff]  ;;  %v690_v51 = vpack.c.bf16 %v333_v48, %v331_v47  ;;  %v335_v53 = vld [vmem:[#allocation6 + $0x100] sm:$0xff]  ;;  %v337_v54 = vld [vmem:[#allocation6 + $0x110] sm:$0xff] }
  0x94   : > { %669 = vmatprep.subr.bf16.mxu0 %v668_v14  ;;  %726 = vmatprep.subr.bf16.mxu1 %v668_v14  ;;  %v692_v52 = vpack.c.bf16 %v338_v50, %v336_v49  ;;  %v340_v55 = vld [vmem:[#allocation6 + $0x128] sm:$0xff]  ;;  %v342_v56 = vld [vmem:[#allocation6 + $0x138] sm:$0xff]  ;;  %v694_v57 = vpack.c.bf16 %v337_v54, %v335_v53  ;;  %v339_v59 = vld [vmem:[#allocation6 + $0x120] sm:$0xff] }
  0x95   : > { %v696_v58 = vpack.c.bf16 %v342_v56, %v340_v55  ;;  %v341_v60 = vld [vmem:[#allocation6 + $0x130] sm:$0xff]  ;;  %v344_v61 = vld [vmem:[#allocation6 + $0x148] sm:$0xff]  ;;  %v346_v62 = vld [vmem:[#allocation6 + $0x158] sm:$0xff] }
  0x96   : > { %v698_v63 = vpack.c.bf16 %v341_v60, %v339_v59  ;;  %v700_v0 = vpack.c.bf16 %v346_v62, %v344_v61  ;;  %v343_v1 = vld [vmem:[#allocation6 + $0x140] sm:$0xff]  ;;  %v345_v2 = vld [vmem:[#allocation6 + $0x150] sm:$0xff]  ;;  %v348_v3 = vld [vmem:[#allocation6 + $0x168] sm:$0xff] }
  0x97   : > { %v350_v4 = vld [vmem:[#allocation6 + $0x178] sm:$0xff]  ;;  %v702_v5 = vpack.c.bf16 %v345_v2, %v343_v1  ;;  %v347_v7 = vld [vmem:[#allocation6 + $0x160] sm:$0xff]  ;;  %v349_v8 = vld [vmem:[#allocation6 + $0x170] sm:$0xff] }
  0x98   : > { %v704_v6 = vpack.c.bf16 %v350_v4, %v348_v3  ;;  %v352_v9 = vld [vmem:[#allocation6 + $0x188] sm:$0xff]  ;;  %v354_v10 = vld [vmem:[#allocation6 + $0x198] sm:$0xff]  ;;  %v706_v11 = vpack.c.bf16 %v349_v8, %v347_v7  ;;  %v351_v13 = vld [vmem:[#allocation6 + $0x180] sm:$0xff] }
  0x99   : > { %v708_v12 = vpack.c.bf16 %v354_v10, %v352_v9  ;;  %v353_v14 = vld [vmem:[#allocation6 + $0x190] sm:$0xff]  ;;  %v356_v15 = vld [vmem:[#allocation6 + $0x1a8] sm:$0xff]  ;;  %v358_v16 = vld [vmem:[#allocation6 + $0x1b8] sm:$0xff] }
  0x9a   : > { %v710_v17 = vpack.c.bf16 %v353_v14, %v351_v13  ;;  %v712_v18 = vpack.c.bf16 %v358_v16, %v356_v15  ;;  %v360_v21 = vld [vmem:[#allocation6 + $0x1c8] sm:$0xff]  ;;  %v362_v22 = vld [vmem:[#allocation6 + $0x1d8] sm:$0xff]  ;;  %v359_v25 = vld [vmem:[#allocation6 + $0x1c0] sm:$0xff] }
  0x9b   : > { %671 = vmatpush1.bf16.xpose.msra.mxu0 %v670_v19  ;;  %742 = vmatpush1.bf16.xpose.msra.mxu1 %v670_v19  ;;  %v355_v19 = vld [vmem:[#allocation6 + $0x1a0] sm:$0xff]  ;;  %v716_v24 = vpack.c.bf16 %v362_v22, %v360_v21  ;;  %v361_v26 = vld [vmem:[#allocation6 + $0x1d0] sm:$0xff]  ;;  %v290_v36 = vld [vmem:[%s1214_s14 + $0x18] sm:$0xff] }
  0x9c   : > { %673 = vmatprep.subr.bf16.mxu0 %v672_v20  ;;  %727 = vmatprep.subr.bf16.mxu1 %v672_v20  ;;  %v357_v20 = vld [vmem:[#allocation6 + $0x1b0] sm:$0xff]  ;;  %v718_v29 = vpack.c.bf16 %v361_v26, %v359_v25  ;;  %v363_v31 = vld [vmem:[#allocation6 + $0x1e0] sm:$0xff]  ;;  %v294_v37 = vld [vmem:[%s1214_s14 + $0x38] sm:$0xff] }
  0x9d   : > { %v714_v23 = vpack.c.bf16 %v357_v20, %v355_v19  ;;  %v365_v32 = vld [vmem:[#allocation6 + $0x1f0] sm:$0xff]  ;;  %v291_v35 = vld [vmem:[%s1214_s14 + $0x20] sm:$0xff]  ;;  %v296_v41 = vld [vmem:[%s1221_s9 + $0x8] sm:$0xff] }
  0x9e   : > { %v289_v38 = vld [vmem:[%s1214_s14 + $0x10] sm:$0xff]  ;;  %v298_v43 = vld [vmem:[%s1221_s9 + $0x18] sm:$0xff]  ;;  %v478_v50 = vmul.f32 %v296_v41, %v296_v41  ;;  %v367_v9 = vld [vmem:[#allocation7] sm:$0x3] }
  0x9f   : > { %v297_v42 = vld [vmem:[%s1221_s9 + $0x10] sm:$0xff]  ;;  %v471_v47 = vadd.f32 %v298_v43, %v296_v41  ;;  %v302_v53 = vld [vmem:[%s1221_s9 + $0x38] sm:$0xff]  ;;  %v480_v55 = vmul.f32 %v298_v43, %v298_v43 }
  0xa1   : > { %v488_v61 = vadd.f32 %v480_v55, %v478_v50 }
  0xa3   : > { %675 = vmatpush1.bf16.xpose.msra.mxu0 %v674_v27  ;;  %743 = vmatpush1.bf16.xpose.msra.mxu1 %v674_v27  ;;  %v364_v27 = vld [vmem:[#allocation6 + $0x1e8] sm:$0xff] }
  0xa4   : > { %677 = vmatprep.subr.bf16.mxu0 %v676_v28  ;;  %728 = vmatprep.subr.bf16.mxu1 %v676_v28  ;;  %v366_v28 = vld [vmem:[#allocation6 + $0x1f8] sm:$0xff] }
  0xa5   : > { %v720_v30 = vpack.c.bf16 %v366_v28, %v364_v27 }
  0xab   : > { %679 = vmatpush1.bf16.xpose.msra.mxu0 %v678_v33  ;;  %744 = vmatpush1.bf16.xpose.msra.mxu1 %v678_v33  ;;  %v722_v33 = vpack.c.bf16 %v365_v32, %v363_v31 }
  0xac   : > { %681 = vmatprep.subr.bf16.mxu0 %v680_v34  ;;  %729 = vmatprep.subr.bf16.mxu1 %v680_v34  ;;  %v287_v34 = vld [vmem:[%s1214_s14] sm:$0xff] }
  0xb3   : > { %683 = vmatpush1.bf16.xpose.msra.mxu0 %v682_v39  ;;  %745 = vmatpush1.bf16.xpose.msra.mxu1 %v682_v39  ;;  %v293_v39 = vld [vmem:[%s1214_s14 + $0x30] sm:$0xff] }
  0xb4   : > { %685 = vmatprep.subr.bf16.mxu0 %v684_v40  ;;  %730 = vmatprep.subr.bf16.mxu1 %v684_v40  ;;  %v295_v40 = vld [vmem:[%s1221_s9] sm:$0xff] }
  0xb5   : > { %v468_v44 = vadd.f32 %v297_v42, %v295_v40  ;;  %v477_v49 = vmul.f32 %v295_v40, %v295_v40 }
  0xbb   : > { %687 = vmatpush1.bf16.xpose.msra.mxu0 %v686_v45  ;;  %746 = vmatpush1.bf16.xpose.msra.mxu1 %v686_v45  ;;  %v299_v45 = vld [vmem:[%s1221_s9 + $0x20] sm:$0xff] }
  0xbc   : > { %689 = vmatprep.subr.bf16.mxu0 %v688_v46  ;;  %731 = vmatprep.subr.bf16.mxu1 %v688_v46  ;;  %v300_v46 = vld [vmem:[%s1221_s9 + $0x28] sm:$0xff]  ;;  %v469_v48 = vadd.f32 %v468_v44, %v299_v45 }
  0xbd   : > { %v472_v54 = vadd.f32 %v471_v47, %v300_v46 }
  0xbf   : > { %v473_v60 = vadd.f32 %v472_v54, %v302_v53 }
  0xc3   : > { %691 = vmatpush1.bf16.xpose.msra.mxu0 %v690_v51  ;;  %747 = vmatpush1.bf16.xpose.msra.mxu1 %v690_v51  ;;  %v479_v51 = vmul.f32 %v297_v42, %v297_v42 }
  0xc4   : > { %693 = vmatprep.subr.bf16.mxu0 %v692_v52  ;;  %732 = vmatprep.subr.bf16.mxu1 %v692_v52  ;;  %v301_v52 = vld [vmem:[%s1221_s9 + $0x30] sm:$0xff] }
  0xc5   : > { %v470_v56 = vadd.f32 %v469_v48, %v301_v52  ;;  %v485_v59 = vadd.f32 %v479_v51, %v477_v49  ;;  %v483_v62 = vmul.f32 %v301_v52, %v301_v52 }
  0xc7   : > { %v474_v1 = vadd.f32 %v473_v60, %v470_v56 }
  0xc9   : > { %475 = vadd.xlane.f32.xlu0 %v474_v1 }
  0xcb   : > { %695 = vmatpush1.bf16.xpose.msra.mxu0 %v694_v57  ;;  %748 = vmatpush1.bf16.xpose.msra.mxu1 %v694_v57  ;;  %v481_v57 = vmul.f32 %v299_v45, %v299_v45 }
  0xcc   : > { %697 = vmatprep.subr.bf16.mxu0 %v696_v58  ;;  %733 = vmatprep.subr.bf16.mxu1 %v696_v58  ;;  %v482_v58 = vmul.f32 %v300_v46, %v300_v46 }
  0xce   : > { %v489_v2 = vadd.f32 %v488_v61, %v482_v58 }
  0xd3   : > { %699 = vmatpush1.bf16.xpose.msra.mxu0 %v698_v63  ;;  %749 = vmatpush1.bf16.xpose.msra.mxu1 %v698_v63  ;;  %v484_v63 = vmul.f32 %v302_v53, %v302_v53 }
  0xd4   : > { %701 = vmatprep.subr.bf16.mxu0 %v700_v0  ;;  %734 = vmatprep.subr.bf16.mxu1 %v700_v0  ;;  %v486_v0 = vadd.f32 %v485_v59, %v481_v57 }
  0xd5   : > { %v490_v4 = vadd.f32 %v489_v2, %v484_v63 }
  0xd6   : > { %v487_v3 = vadd.f32 %v486_v0, %v483_v62 }
  0xdb   : > { %703 = vmatpush1.bf16.xpose.msra.mxu0 %v702_v5  ;;  %750 = vmatpush1.bf16.xpose.msra.mxu1 %v702_v5  ;;  %v491_v5 = vadd.f32 %v490_v4, %v487_v3 }
  0xdc   : > { %705 = vmatprep.subr.bf16.mxu0 %v704_v6  ;;  %735 = vmatprep.subr.bf16.mxu1 %v704_v6  ;;  %v369_v6 = vlaneseq }
  0xdd   : > { %492 = vadd.xlane.f32.xlu0 %v491_v5 }
  0xde   : > { %v370_v7 = vshrl.u32 %v369_v6, 7 }
  0xe0   : > { %v371_v8 = vsub.s32 0, %v370_v7  ;;  %v375_v10 = vsub.s32 1, %v370_v7 }
  0xe2   : > { %v376_v13 = vrot.slane %v367_v9, %v375_v10 }
  0xe3   : > { %707 = vmatpush1.bf16.xpose.msra.mxu0 %v706_v11  ;;  %751 = vmatpush1.bf16.xpose.msra.mxu1 %v706_v11  ;;  %v372_v11 = vrot.slane %v367_v9, %v371_v8 }
  0xe4   : > { %709 = vmatprep.subr.bf16.mxu0 %v708_v12  ;;  %736 = vmatprep.subr.bf16.mxu1 %v708_v12 }
  0xeb   : > { %711 = vmatpush1.bf16.xpose.msra.mxu0 %v710_v17  ;;  %752 = vmatpush1.bf16.xpose.msra.mxu1 %v710_v17 }
  0xec   : > { %713 = vmatprep.subr.bf16.mxu0 %v712_v18  ;;  %737 = vmatprep.subr.bf16.mxu1 %v712_v18 }
  0xf3   : > { %715 = vmatpush1.bf16.xpose.msra.mxu0 %v714_v23  ;;  %753 = vmatpush1.bf16.xpose.msra.mxu1 %v714_v23 }
  0xf4   : > { %717 = vmatprep.subr.bf16.mxu0 %v716_v24  ;;  %738 = vmatprep.subr.bf16.mxu1 %v716_v24 }
  0xfb   : > { %719 = vmatpush1.bf16.xpose.msra.mxu0 %v718_v29  ;;  %754 = vmatpush1.bf16.xpose.msra.mxu1 %v718_v29 }
  0xfc   : > { %721 = vmatprep.subr.bf16.mxu0 %v720_v30  ;;  %739 = vmatprep.subr.bf16.mxu1 %v720_v30 }
 0x103   : > { %723 = vmatpush1.bf16.xpose.msra.mxu0 %v722_v33  ;;  %755 = vmatpush1.bf16.xpose.msra.mxu1 %v722_v33 }
 0x10a   : > { %444 = vmatmul.mubr.f32.vlgmr.msra.gmra.mrb[0].mxu0 %v287_v34  ;;  %456 = vmatmul.mubr.f32.vlgmr.msra.gmra.mrb[0].mxu1 %v291_v35 }
 0x10b   : > { %449 = vmatprep.mubr.f32.mxu0 %v290_v36  ;;  %461 = vmatprep.mubr.f32.mxu1 %v294_v37 }
 0x10e   : > { %450 = vmatmul.mubr.f32.gmra.mrb[2].mxu0 %v289_v38  ;;  %462 = vmatmul.mubr.f32.gmra.mrb[2].mxu1 %v293_v39 }
 0x156   : > { %v476_v51 = vpop.xlane.xlu0 %475 }
 0x16a   : > { %v493_v52 = vpop.xlane.xlu0 %492 }
 0x16b   : > { %v521_v54 = vsel %vm520_vm0, %v476_v51, %v493_v52 }
 0x1dd   : > { %v445_v12 = vpop.f32.mrb[0].mxu0  ;;  %v457_v14 = vpop.f32.mrb[0].mxu1 }
 0x1de   : > { %v447_v15 = vpop.f32.mrb[1].mxu0  ;;  %v459_v16 = vpop.f32.mrb[1].mxu1  ;;  %v446_v17 = vadd.f32 %v445_v12, %v372_v11  ;;  %v458_v21 = vadd.f32 %v457_v14, %v372_v11 }
 0x1df   : > { %v448_v18 = vadd.f32 %v447_v15, %v376_v13  ;;  %v460_v26 = vadd.f32 %v459_v16, %v376_v13 }
 0x1e0   : > { %v503_v29 = vmul.f32 %v446_v17, %v446_v17  ;;  %v507_v35 = vmul.f32 %v458_v21, %v458_v21 }
 0x1e1   : > { %v451_v19 = vpop.f32.mrb[2].mxu0  ;;  %v463_v20 = vpop.f32.mrb[2].mxu1  ;;  %v504_v32 = vmul.f32 %v448_v18, %v448_v18  ;;  %v508_v39 = vmul.f32 %v460_v26, %v460_v26 }
 0x1e2   : > { %v452_v22 = vadd.f32 %v451_v19, %v372_v11  ;;  %v453_v23 = vpop.f32.mrb[3].mxu0  ;;  %v464_v24 = vadd.f32 %v463_v20, %v372_v11  ;;  %v465_v25 = vpop.f32.mrb[3].mxu1 }
 0x1e3   : > { %v454_v27 = vadd.f32 %v453_v23, %v376_v13  ;;  %v466_v28 = vadd.f32 %v465_v25, %v376_v13 }
 0x1e4   : > { %v494_v30 = vadd.f32 %v452_v22, %v446_v17  ;;  %v505_v31 = vmul.f32 %v452_v22, %v452_v22  ;;  %v509_v37 = vmul.f32 %v464_v24, %v464_v24 }
 0x1e5   : > { %v497_v33 = vadd.f32 %v454_v27, %v448_v18  ;;  %v506_v34 = vmul.f32 %v454_v27, %v454_v27  ;;  %v510_v41 = vmul.f32 %v466_v28, %v466_v28 }
 0x1e6   : > { %v511_v36 = vadd.f32 %v505_v31, %v503_v29  ;;  %v495_v38 = vadd.f32 %v494_v30, %v458_v21 }
 0x1e7   : > { %v514_v40 = vadd.f32 %v506_v34, %v504_v32  ;;  %v498_v42 = vadd.f32 %v497_v33, %v460_v26 }
 0x1e8   : > { %v496_v43 = vadd.f32 %v495_v38, %v464_v24  ;;  %v512_v44 = vadd.f32 %v511_v36, %v507_v35 }
 0x1e9   : > { %v499_v45 = vadd.f32 %v498_v42, %v466_v28  ;;  %v515_v46 = vadd.f32 %v514_v40, %v508_v39 }
 0x1ea   : > { %v513_v47 = vadd.f32 %v512_v44, %v509_v37 }
 0x1eb   : > { %v500_v48 = vadd.f32 %v499_v45, %v496_v43  ;;  %v516_v49 = vadd.f32 %v515_v46, %v510_v41 }
 0x1ed   : > { %501 = vadd.xlane.f32.xlu1 %v500_v48  ;;  %v517_v50 = vadd.f32 %v516_v49, %v513_v47 }
 0x1f1   : > { %518 = vadd.xlane.f32.xlu1 %v517_v50 }
 0x27a   : > { %v502_v53 = vpop.xlane.xlu1 %501 }
 0x27b   : > { %v523_v55 = vsel %vm522_vm1, %v521_v54, %v502_v53 }
 0x27e   : > { %v519_v56 = vpop.xlane.xlu1 %518 }
 0x27f   : > { %v525_v57 = vsel %vm524_vm2, %v523_v55, %v519_v56 }
 0x280   : > { %527 = vst.msk [vmem:[%s286_s23] sm:$0xff] %vm526_vm3, %v525_v57 }
 0x281 PF: > { %p18_p12 = scmp.ge.s32.totalorder %s1114_s5, 4   ;;  %s1287_s15 = smov %s977_s16 }
 0x282   : > { %s1288_s16 = smov %s981_s17  ;;  %s1289_s17 = smov %s1125_s8 }
 0x283   : > { %s1290_s18 = smov %s1114_s5  ;;  %20 = sbr.rel (!%p18_p12) target bundleno = 6 (0x6), region = 97 }
 0x28a   :  { %547 = vsyncpa [#allocation3], 1 }
 0x28b   :  { %549 = vsyncpa [#allocation3 + $0x1], 1 }
 0x28c   :  { %550 = vsyncpa [#allocation5], 1 }
 0x28d   :  { %552 = vsyncpa [#allocation5 + $0x1], 1 }
 0x28e   :  { %553 = vsyncpa [#allocation8], 1 }

// kernel: gated_embedding_unit_reasoning.3
= control target key start
LH: loop header
LB: loop body
LE: loop exit
PB: predicated region body
PF: predicated region fallthrough
CT: control target
= control target key end

     0   :  { %10 = vsyncpa [#allocation3], 0  ;;  %s1435_s0 = inlined_call_operand.vmem [shape: f32[8,8,256], index: 0, kind: input, shape index: {}]   ;;  %s1436_s1 = inlined_call_operand.vmem [shape: f32[8,8,256], index: 1, kind: input, shape index: {}]   ;;  %s1437_s2 = inlined_call_operand.vmem [shape: f32[256,256], index: 2, kind: input, shape index: {}]   ;;  %s1438_s3 = inlined_call_operand.vmem [shape: f32[1,256], index: 3, kind: input, shape index: {}]   ;;  %s1439_s4 = inlined_call_operand.vmem [shape: f32[3,8,1], index: 4, kind: input, shape index: {}]   ;;  %s1440_s5 = inlined_call_operand.hbm [shape: f32[8,8,256], index: 5, kind: output, shape index: {}]  }
   0x1   :  { %12 = vsyncpa [#allocation3 + $0x1], 0  ;;  %s1033_s18 = smov 0   ;;  %s1035_s19 = smov 0  }
   0x2   :  { %s1037_s20 = smov 0   ;;  %s1039_s21 = smov 0  }
   0x3 LB: > { %s1054_s22 = sadd.s32 4294967295, %s997_s21   ;;  %s718_s23 = sadd.s32 4294967294, %s997_s21   ;;  %s997_s21 = sphi %s1039_s21, %s1446_s21   ;;  %s993_s20 = sphi %s1037_s20, %s1445_s20   ;;  %s989_s19 = sphi %s1035_s19, %s1444_s19   ;;  %s985_s18 = sphi %s1033_s18, %s1443_s18  }
   0x4   : > { %s1058_s24 = sadd.s32 1, %s997_s21   ;;  %s140_s25 = sadd.s32 1, %s993_s20 }
   0x5   : > { %s137_s26 = ssub.s32 %s997_s21, %s1058_s24  ;;  %p150_p0 = scmp.ne.s32.totalorder %s993_s20, %s989_s19 }
   0x6   : > { %p138_p1 = scmp.eq.s32.totalorder %s137_s26, 0  ;;  %p151_p2 = scmp.eq.s32.totalorder %s1054_s22, 1 }
   0x7   : > { %p156_p3 = scmp.ne.s32.totalorder %s989_s19, %s985_s18  ;;  %p157_p4 = scmp.eq.s32.totalorder %s718_s23, 1 }
   0x8   : > { %s1069_s27 = scalar_select %p138_p1, %s993_s20, %s140_s25  }
   0x9   : > { %p1071_p5 = por %p151_p2, %p150_p0  ;;  %p1075_p6 = por %p157_p4, %p156_p3 }
   0xa   : > { %p721_p7 = scmp.ge.s32.totalorder %s997_s21, 1  ;;  %p204_p8 = scmp.lt.s32.totalorder %s997_s21, 3 }
   0xc   : > { %p205_p9 = pnand %p721_p7, %p204_p8 }
   0xd   : > { %v271_v0 = vld [vmem:[%s1437_s2 + $0x8] sm:$0xff] (!%p205_p9)  ;;  %v273_v1 = vld [vmem:[%s1437_s2 + $0x18] sm:$0xff] (!%p205_p9)  ;;  %v270_v2 = vld [vmem:[%s1437_s2] sm:$0xff] (!%p205_p9)  ;;  %s723_s17 = sshll.u32 (!%p205_p9), %s1054_s22, 2  ;;  %v999_v14 = vmov (!%p205_p9), 0   ;;  %s746_s14 = sshll.u32 (!%p205_p9), %s1054_s22, 10 }
   0xe   : > { %208 = sbr.rel (%p205_p9) target bundleno = 443 (0x1bb), region = 40  ;;  %v747_v3 = vpack.c.bf16 (!%p205_p9), %v273_v1, %v271_v0  ;;  %v272_v4 = vld [vmem:[%s1437_s2 + $0x10] sm:$0xff] (!%p205_p9)  ;;  %v275_v5 = vld [vmem:[%s1437_s2 + $0x28] sm:$0xff] (!%p205_p9)  ;;  %v277_v6 = vld [vmem:[%s1437_s2 + $0x38] sm:$0xff] (!%p205_p9)  ;;  %p240_p10 = scmp.lt.s32.totalorder (!%p205_p9), %s723_s17, 7  ;;  %885 = vset.pattern.permute.xlu0 (!%p205_p9), %v999_v14  ;;  %886 = vset.pattern.permute.xlu1 (!%p205_p9), %v999_v14 }
   0xf   : > { %v749_v7 = vpack.c.bf16 (!%p205_p9), %v272_v4, %v270_v2  ;;  %v751_v8 = vpack.c.bf16 (!%p205_p9), %v277_v6, %v275_v5  ;;  %v274_v9 = vld [vmem:[%s1437_s2 + $0x20] sm:$0xff] (!%p205_p9)  ;;  %v276_v10 = vld [vmem:[%s1437_s2 + $0x30] sm:$0xff] (!%p205_p9)  ;;  %v279_v11 = vld [vmem:[%s1437_s2 + $0x48] sm:$0xff] (!%p205_p9)  ;;  %s1387_s26 = scalar_lea.hbm (!%p205_p9), %s1440_s5, %s746_s14  ;;  %s1000_s7 = smov (!%p205_p9), [#allocation2]  }
  0x10   : > { %748 = vmatprep.subr.bf16.mxu0 (!%p205_p9), %v747_v3  ;;  %811 = vmatprep.subr.bf16.mxu1 (!%p205_p9), %v747_v3  ;;  %v281_v12 = vld [vmem:[%s1437_s2 + $0x58] sm:$0xff] (!%p205_p9)  ;;  %v753_v13 = vpack.c.bf16 (!%p205_p9), %v276_v10, %v274_v9  ;;  %v278_v16 = vld [vmem:[%s1437_s2 + $0x40] sm:$0xff] (!%p205_p9)  ;;  %v280_v17 = vld [vmem:[%s1437_s2 + $0x50] sm:$0xff] (!%p205_p9)  ;;  %s939_s8 = sshll.u32 (!%p205_p9), %s1000_s7, 4  ;;  %s940_s8 = int_to_ptr.vmem [resolvable:$false] %s939_s8 }
  0x11   : > { %750 = vmatpush1.bf16.xpose.msra.mxu0 (!%p205_p9), %v749_v7  ;;  %827 = vmatpush1.bf16.xpose.msra.mxu1 (!%p205_p9), %v749_v7  ;;  %v755_v15 = vpack.c.bf16 (!%p205_p9), %v281_v12, %v279_v11  ;;  %v283_v18 = vld [vmem:[%s1437_s2 + $0x68] sm:$0xff] (!%p205_p9)  ;;  %v285_v19 = vld [vmem:[%s1437_s2 + $0x78] sm:$0xff] (!%p205_p9)  ;;  %v757_v20 = vpack.c.bf16 (!%p205_p9), %v280_v17, %v278_v16  ;;  %v282_v22 = vld [vmem:[%s1437_s2 + $0x60] sm:$0xff] (!%p205_p9)  ;;  %s941_s9 = scalar_lea.vmem (!%p205_p9), %s940_s8, 2048 }
  0x12   : > { %752 = vmatprep.subr.bf16.mxu0 (!%p205_p9), %v751_v8  ;;  %812 = vmatprep.subr.bf16.mxu1 (!%p205_p9), %v751_v8  ;;  %v759_v21 = vpack.c.bf16 (!%p205_p9), %v285_v19, %v283_v18  ;;  %v284_v23 = vld [vmem:[%s1437_s2 + $0x70] sm:$0xff] (!%p205_p9)  ;;  %v287_v26 = vld [vmem:[%s1437_s2 + $0x88] sm:$0xff] (!%p205_p9)  ;;  %v289_v27 = vld [vmem:[%s1437_s2 + $0x98] sm:$0xff] (!%p205_p9) }
  0x13   : > { %v761_v28 = vpack.c.bf16 (!%p205_p9), %v284_v23, %v282_v22  ;;  %v335_v29 = vld [vmem:[%s1439_s4] sm:$0xff] (!%p205_p9)  ;;  %v337_v30 = vld [vmem:[%s1439_s4 + $0x10] sm:$0xff] (!%p205_p9)  ;;  %v763_v31 = vpack.c.bf16 (!%p205_p9), %v289_v27, %v287_v26  ;;  %v336_v32 = vld [vmem:[%s1439_s4 + $0x8] sm:$0xff] (!%p205_p9) }
  0x14   : > { %440 = vperm.xlu0 (!%p205_p9), %885, %v335_v29   ;;  %474 = vperm.xlu1 (!%p205_p9), %886, %v337_v30   ;;  %v286_v33 = vld [vmem:[%s1437_s2 + $0x80] sm:$0xff] (!%p205_p9)  ;;  %v288_v34 = vld [vmem:[%s1437_s2 + $0x90] sm:$0xff] (!%p205_p9)  ;;  %v291_v35 = vld [vmem:[%s1437_s2 + $0xa8] sm:$0xff] (!%p205_p9) }
  0x15   : > { %s1448_s17 = smov (!%p240_p10, %s723_s17), 7  ;;  %v293_v36 = vld [vmem:[%s1437_s2 + $0xb8] sm:$0xff]  ;;  %v765_v37 = vpack.c.bf16 %v288_v34, %v286_v33  ;;  %v290_v39 = vld [vmem:[%s1437_s2 + $0xa0] sm:$0xff]  ;;  %v292_v40 = vld [vmem:[%s1437_s2 + $0xb0] sm:$0xff] }
  0x16   : > { %s743_s25 = sshll.u32 %s1448_s17, 4  ;;  %v767_v38 = vpack.c.bf16 %v293_v36, %v291_v35  ;;  %v295_v41 = vld [vmem:[%s1437_s2 + $0xc8] sm:$0xff]  ;;  %v297_v42 = vld [vmem:[%s1437_s2 + $0xd8] sm:$0xff]  ;;  %v769_v43 = vpack.c.bf16 %v292_v40, %v290_v39  ;;  %v294_v45 = vld [vmem:[%s1437_s2 + $0xc0] sm:$0xff]  ;;  %s236_s17 = sand.u32 1, %s989_s19  }
  0x17   : > { %s1132_s6 = scalar_lea.vmem %s1435_s0, %s743_s25  ;;  %v771_v44 = vpack.c.bf16 %v297_v42, %v295_v41  ;;  %v296_v46 = vld [vmem:[%s1437_s2 + $0xd0] sm:$0xff]  ;;  %v299_v47 = vld [vmem:[%s1437_s2 + $0xe8] sm:$0xff]  ;;  %v301_v48 = vld [vmem:[%s1437_s2 + $0xf8] sm:$0xff]  ;;  %s251_s13 = scalar_lea.vmem %s1436_s1, %s743_s25 }
  0x18   : > { %v1141_v24 = vld [vmem:[%s1132_s6 + $0x8] sm:$0xff]  ;;  %453 = vperm.xlu0 %885, %v336_v32   ;;  %v773_v49 = vpack.c.bf16 %v296_v46, %v294_v45  ;;  %v775_v50 = vpack.c.bf16 %v301_v48, %v299_v47  ;;  %v298_v51 = vld [vmem:[%s1437_s2 + $0xe0] sm:$0xff]  ;;  %v300_v52 = vld [vmem:[%s1437_s2 + $0xf0] sm:$0xff]  ;;  %v339_v46 = vlaneseq  ;;  %s722_s25 = sshll.u32 %s236_s17, 6  ;;  %s1394_s22 = scalar_lea.sflag [#allocation3], %s236_s17 }
  0x19   : > { %754 = vmatpush1.bf16.xpose.msra.mxu0 %v753_v13  ;;  %828 = vmatpush1.bf16.xpose.msra.mxu1 %v753_v13  ;;  %v1144_v25 = vld [vmem:[%s1132_s6 + $0x28] sm:$0xff]  ;;  %v305_v54 = vld [vmem:[%s1437_s2 + $0x118] sm:$0xff]  ;;  %v777_v55 = vpack.c.bf16 %v300_v52, %v298_v51  ;;  %v302_v57 = vld [vmem:[%s1437_s2 + $0x100] sm:$0xff] }
  0x1a   : > { %756 = vmatprep.subr.bf16.mxu0 %v755_v15  ;;  %813 = vmatprep.subr.bf16.mxu1 %v755_v15  ;;  %v303_v53 = vld [vmem:[%s1437_s2 + $0x108] sm:$0xff]  ;;  %v304_v58 = vld [vmem:[%s1437_s2 + $0x110] sm:$0xff]  ;;  %v309_v60 = vld [vmem:[%s1437_s2 + $0x138] sm:$0xff]  ;;  %v340_v47 = vshrl.u32 %v339_v46, 7 }
  0x1b   : > { %413 = vmatprep.mubr.f32.mxu0 %v1141_v24  ;;  %425 = vmatprep.mubr.f32.mxu1 %v1144_v25  ;;  %v779_v56 = vpack.c.bf16 %v305_v54, %v303_v53  ;;  %v307_v59 = vld [vmem:[%s1437_s2 + $0x128] sm:$0xff]  ;;  %v781_v61 = vpack.c.bf16 %v304_v58, %v302_v57  ;;  %v306_v63 = vld [vmem:[%s1437_s2 + $0x120] sm:$0xff]  ;;  %v308_v0 = vld [vmem:[%s1437_s2 + $0x130] sm:$0xff] }
  0x1c   : > { %v783_v62 = vpack.c.bf16 %v309_v60, %v307_v59  ;;  %v311_v1 = vld [vmem:[%s1437_s2 + $0x148] sm:$0xff]  ;;  %v313_v2 = vld [vmem:[%s1437_s2 + $0x158] sm:$0xff]  ;;  %v785_v3 = vpack.c.bf16 %v308_v0, %v306_v63  ;;  %v310_v5 = vld [vmem:[%s1437_s2 + $0x140] sm:$0xff]  ;;  %v345_v51 = vsub.s32 1, %v340_v47 }
  0x1d   : > { %v787_v4 = vpack.c.bf16 %v313_v2, %v311_v1  ;;  %v312_v6 = vld [vmem:[%s1437_s2 + $0x150] sm:$0xff]  ;;  %v315_v7 = vld [vmem:[%s1437_s2 + $0x168] sm:$0xff]  ;;  %v317_v8 = vld [vmem:[%s1437_s2 + $0x178] sm:$0xff] }
  0x1e   : > { %v789_v9 = vpack.c.bf16 %v312_v6, %v310_v5  ;;  %v791_v10 = vpack.c.bf16 %v317_v8, %v315_v7  ;;  %v314_v11 = vld [vmem:[%s1437_s2 + $0x160] sm:$0xff]  ;;  %v316_v12 = vld [vmem:[%s1437_s2 + $0x170] sm:$0xff]  ;;  %v319_v13 = vld [vmem:[%s1437_s2 + $0x188] sm:$0xff] }
  0x1f   : > { %v321_v14 = vld [vmem:[%s1437_s2 + $0x198] sm:$0xff]  ;;  %v793_v15 = vpack.c.bf16 %v316_v12, %v314_v11  ;;  %v318_v17 = vld [vmem:[%s1437_s2 + $0x180] sm:$0xff]  ;;  %v320_v18 = vld [vmem:[%s1437_s2 + $0x190] sm:$0xff] }
  0x20   : > { %v795_v16 = vpack.c.bf16 %v321_v14, %v319_v13  ;;  %v323_v19 = vld [vmem:[%s1437_s2 + $0x1a8] sm:$0xff]  ;;  %v322_v23 = vld [vmem:[%s1437_s2 + $0x1a0] sm:$0xff]  ;;  %v324_v26 = vld [vmem:[%s1437_s2 + $0x1b0] sm:$0xff] }
  0x21   : > { %758 = vmatpush1.bf16.xpose.msra.mxu0 %v757_v20  ;;  %829 = vmatpush1.bf16.xpose.msra.mxu1 %v757_v20  ;;  %v325_v20 = vld [vmem:[%s1437_s2 + $0x1b8] sm:$0xff]  ;;  %v327_v27 = vld [vmem:[%s1437_s2 + $0x1c8] sm:$0xff]  ;;  %v801_v29 = vpack.c.bf16 %v324_v26, %v322_v23  ;;  %v328_v32 = vld [vmem:[%s1437_s2 + $0x1d0] sm:$0xff] }
  0x22   : > { %760 = vmatprep.subr.bf16.mxu0 %v759_v21  ;;  %814 = vmatprep.subr.bf16.mxu1 %v759_v21  ;;  %v797_v21 = vpack.c.bf16 %v320_v18, %v318_v17  ;;  %v799_v22 = vpack.c.bf16 %v325_v20, %v323_v19  ;;  %v331_v33 = vld [vmem:[%s1437_s2 + $0x1e8] sm:$0xff]  ;;  %v333_v34 = vld [vmem:[%s1437_s2 + $0x1f8] sm:$0xff]  ;;  %v1302_v40 = vld [vmem:[%s1132_s6] sm:$0xff] }
  0x23   : > { %v807_v36 = vpack.c.bf16 %v333_v34, %v331_v33  ;;  %v1305_v41 = vld [vmem:[%s1132_s6 + $0x20] sm:$0xff]  ;;  %v1308_v42 = vld [vmem:[%s1132_s6 + $0x18] sm:$0xff]  ;;  %v1321_v45 = vld [vmem:[%s1132_s6 + $0x30] sm:$0xff] }
  0x24   : > { %v262_v54 = vld [vmem:[%s251_s13] sm:$0xff]  ;;  %v263_v57 = vld [vmem:[%s251_s13 + $0x8] sm:$0xff] }
  0x25   : > { %v267_v58 = vld [vmem:[%s251_s13 + $0x28] sm:$0xff] }
  0x29   : > { %762 = vmatpush1.bf16.xpose.msra.mxu0 %v761_v28  ;;  %830 = vmatpush1.bf16.xpose.msra.mxu1 %v761_v28  ;;  %v329_v28 = vld [vmem:[%s1437_s2 + $0x1d8] sm:$0xff] }
  0x2a   : > { %764 = vmatprep.subr.bf16.mxu0 %v763_v31  ;;  %815 = vmatprep.subr.bf16.mxu1 %v763_v31  ;;  %v803_v30 = vpack.c.bf16 %v329_v28, %v327_v27  ;;  %v326_v31 = vld [vmem:[%s1437_s2 + $0x1c0] sm:$0xff] }
  0x2b   : > { %v805_v35 = vpack.c.bf16 %v328_v32, %v326_v31 }
  0x31   : > { %766 = vmatpush1.bf16.xpose.msra.mxu0 %v765_v37  ;;  %831 = vmatpush1.bf16.xpose.msra.mxu1 %v765_v37  ;;  %v330_v37 = vld [vmem:[%s1437_s2 + $0x1e0] sm:$0xff] }
  0x32   : > { %768 = vmatprep.subr.bf16.mxu0 %v767_v38  ;;  %816 = vmatprep.subr.bf16.mxu1 %v767_v38  ;;  %v332_v38 = vld [vmem:[%s1437_s2 + $0x1f0] sm:$0xff] }
  0x33   : > { %v809_v39 = vpack.c.bf16 %v332_v38, %v330_v37 }
  0x39   : > { %770 = vmatpush1.bf16.xpose.msra.mxu0 %v769_v43  ;;  %832 = vmatpush1.bf16.xpose.msra.mxu1 %v769_v43  ;;  %v1311_v43 = vld [vmem:[%s1132_s6 + $0x38] sm:$0xff] }
  0x3a   : > { %772 = vmatprep.subr.bf16.mxu0 %v771_v44  ;;  %817 = vmatprep.subr.bf16.mxu1 %v771_v44  ;;  %v1318_v44 = vld [vmem:[%s1132_s6 + $0x10] sm:$0xff]  ;;  %s238_s6 = scalar_lea.vmem [#allocation2], %s722_s25 }
  0x3b   : > { %s644_s15 = sshll.u32 %s238_s6, 4  ;;  %s1389_s15 = int_to_ptr.vmem [resolvable:$true] %s644_s15 }
  0x3c   : > { %s935_s30 = scalar_lea.vmem %s1389_s15, 1024  ;;  %p942_p0 = scmp.lt.s32.totalorder %s1389_s15, %s940_s8 }
  0x3d   : > { %p936_p11 = scmp.ne.s32.totalorder %s1389_s15, %s935_s30  ;;  %p943_p1 = scmp.lt.s32.totalorder %s941_s9, %s935_s30 }
  0x3f   : > { %p937_p12 = pnand %p936_p11, %p1071_p5  ;;  %p944_p2 = por %p943_p1, %p942_p0 }
  0x41   : > { %774 = vmatpush1.bf16.xpose.msra.mxu0 %v773_v49  ;;  %833 = vmatpush1.bf16.xpose.msra.mxu1 %v773_v49  ;;  %v341_v49 = vsub.s32 0, %v340_v47  ;;  %p938_p13 = pneg %p937_p12 }
  0x42   : > { %776 = vmatprep.subr.bf16.mxu0 %v775_v50  ;;  %818 = vmatprep.subr.bf16.mxu1 %v775_v50  ;;  %v334_v50 = vld [vmem:[%s1438_s3] sm:$0x3] }
  0x43   : > { %v342_v52 = vrot.slane %v334_v50, %v341_v49  ;;  %v346_v53 = vrot.slane %v334_v50, %v345_v51  ;;  %p945_p3 = pnand %p944_p2, %p938_p13 }
  0x49   : > { %778 = vmatpush1.bf16.xpose.msra.mxu0 %v777_v55  ;;  %834 = vmatpush1.bf16.xpose.msra.mxu1 %v777_v55  ;;  %v266_v55 = vld [vmem:[%s251_s13 + $0x20] sm:$0xff] }
  0x4a   : > { %780 = vmatprep.subr.bf16.mxu0 %v779_v56  ;;  %819 = vmatprep.subr.bf16.mxu1 %v779_v56 }
  0x51   : > { %782 = vmatpush1.bf16.xpose.msra.mxu0 %v781_v61  ;;  %835 = vmatpush1.bf16.xpose.msra.mxu1 %v781_v61  ;;  %v264_v61 = vld [vmem:[%s251_s13 + $0x10] sm:$0xff] }
  0x52   : > { %784 = vmatprep.subr.bf16.mxu0 %v783_v62  ;;  %820 = vmatprep.subr.bf16.mxu1 %v783_v62  ;;  %v268_v62 = vld [vmem:[%s251_s13 + $0x30] sm:$0xff] }
  0x59   : > { %786 = vmatpush1.bf16.xpose.msra.mxu0 %v785_v3  ;;  %836 = vmatpush1.bf16.xpose.msra.mxu1 %v785_v3  ;;  %v265_v3 = vld [vmem:[%s251_s13 + $0x18] sm:$0xff] }
  0x5a   : > { %788 = vmatprep.subr.bf16.mxu0 %v787_v4  ;;  %821 = vmatprep.subr.bf16.mxu1 %v787_v4  ;;  %v269_v4 = vld [vmem:[%s251_s13 + $0x38] sm:$0xff] }
  0x61   : > { %790 = vmatpush1.bf16.xpose.msra.mxu0 %v789_v9  ;;  %837 = vmatpush1.bf16.xpose.msra.mxu1 %v789_v9 }
  0x62   : > { %792 = vmatprep.subr.bf16.mxu0 %v791_v10  ;;  %822 = vmatprep.subr.bf16.mxu1 %v791_v10 }
  0x69   : > { %794 = vmatpush1.bf16.xpose.msra.mxu0 %v793_v15  ;;  %838 = vmatpush1.bf16.xpose.msra.mxu1 %v793_v15 }
  0x6a   : > { %796 = vmatprep.subr.bf16.mxu0 %v795_v16  ;;  %823 = vmatprep.subr.bf16.mxu1 %v795_v16 }
  0x71   : > { %798 = vmatpush1.bf16.xpose.msra.mxu0 %v797_v21  ;;  %839 = vmatpush1.bf16.xpose.msra.mxu1 %v797_v21 }
  0x72   : > { %800 = vmatprep.subr.bf16.mxu0 %v799_v22  ;;  %824 = vmatprep.subr.bf16.mxu1 %v799_v22 }
  0x79   : > { %802 = vmatpush1.bf16.xpose.msra.mxu0 %v801_v29  ;;  %840 = vmatpush1.bf16.xpose.msra.mxu1 %v801_v29 }
  0x7a   : > { %804 = vmatprep.subr.bf16.mxu0 %v803_v30  ;;  %825 = vmatprep.subr.bf16.mxu1 %v803_v30 }
  0x81   : > { %806 = vmatpush1.bf16.xpose.msra.mxu0 %v805_v35  ;;  %841 = vmatpush1.bf16.xpose.msra.mxu1 %v805_v35 }
  0x82   : > { %808 = vmatprep.subr.bf16.mxu0 %v807_v36  ;;  %826 = vmatprep.subr.bf16.mxu1 %v807_v36 }
  0x89   : > { %810 = vmatpush1.bf16.xpose.msra.mxu0 %v809_v39  ;;  %842 = vmatpush1.bf16.xpose.msra.mxu1 %v809_v39 }
  0x90   : > { %414 = vmatmul.mubr.f32.vlgmr.msra.gmra.mrb[0].mxu0 %v1302_v40  ;;  %426 = vmatmul.mubr.f32.vlgmr.msra.gmra.mrb[0].mxu1 %v1305_v41 }
  0x91   : > { %419 = vmatprep.mubr.f32.mxu0 %v1308_v42  ;;  %431 = vmatprep.mubr.f32.mxu1 %v1311_v43 }
  0x93   : > { %v441_v48 = vpop.permute.xlu0 %440  ;;  %v475_v15 = vpop.permute.xlu1 %474 }
  0x94   : > { %420 = vmatmul.mubr.f32.gmra.mrb[2].mxu0 %v1318_v44  ;;  %432 = vmatmul.mubr.f32.gmra.mrb[2].mxu1 %v1321_v45  ;;  %v443_v5 = vmul.f32 %v441_v48, %v262_v54  ;;  %v447_v6 = vmul.f32 %v441_v48, %v266_v55  ;;  %v444_v9 = vmul.f32 %v441_v48, %v263_v57 }
  0x95   : > { %v448_v10 = vmul.f32 %v441_v48, %v267_v58  ;;  %v445_v13 = vmul.f32 %v441_v48, %v264_v61  ;;  %v449_v14 = vmul.f32 %v441_v48, %v268_v62  ;;  %v446_v20 = vmul.f32 %v441_v48, %v265_v3 }
  0x96   : > { %v450_v21 = vmul.f32 %v441_v48, %v269_v4 }
  0x97   : > { %v454_v56 = vpop.permute.xlu0 %453 }
 0x163   : > { %v415_v59 = vpop.f32.mrb[0].mxu0  ;;  %v427_v60 = vpop.f32.mrb[0].mxu1 }
 0x164   : > { %v416_v63 = vadd.f32 %v415_v59, %v342_v52  ;;  %v428_v0 = vadd.f32 %v427_v60, %v342_v52  ;;  %v417_v1 = vpop.f32.mrb[1].mxu0  ;;  %v429_v2 = vpop.f32.mrb[1].mxu1 }
 0x165   : > { %v418_v7 = vadd.f32 %v417_v1, %v346_v53  ;;  %v430_v8 = vadd.f32 %v429_v2, %v346_v53 }
 0x166   : > { %v456_v11 = vmul.f32 %v454_v56, %v416_v63  ;;  %v460_v12 = vmul.f32 %v454_v56, %v428_v0 }
 0x167   : > { %v457_v16 = vmul.f32 %v454_v56, %v418_v7  ;;  %v461_v17 = vmul.f32 %v454_v56, %v430_v8  ;;  %v421_v18 = vpop.f32.mrb[2].mxu0  ;;  %v433_v19 = vpop.f32.mrb[2].mxu1 }
 0x168   : > { %v422_v22 = vadd.f32 %v421_v18, %v342_v52  ;;  %v434_v23 = vadd.f32 %v433_v19, %v342_v52  ;;  %v423_v26 = vpop.f32.mrb[3].mxu0  ;;  %v435_v27 = vpop.f32.mrb[3].mxu1  ;;  %v464_v28 = vadd.f32 %v456_v11, %v443_v5  ;;  %v468_v29 = vadd.f32 %v460_v12, %v447_v6 }
 0x169   : > { %v424_v30 = vadd.f32 %v423_v26, %v346_v53  ;;  %v436_v31 = vadd.f32 %v435_v27, %v346_v53  ;;  %v465_v32 = vadd.f32 %v457_v16, %v444_v9  ;;  %v469_v33 = vadd.f32 %v461_v17, %v448_v10 }
 0x16a   : > { %v458_v34 = vmul.f32 %v454_v56, %v422_v22  ;;  %v462_v35 = vmul.f32 %v454_v56, %v434_v23  ;;  %v477_v36 = vadd.f32 %v475_v15, %v464_v28  ;;  %v481_v37 = vadd.f32 %v475_v15, %v468_v29 }
 0x16b   : > { %v459_v38 = vmul.f32 %v454_v56, %v424_v30  ;;  %v463_v39 = vmul.f32 %v454_v56, %v436_v31  ;;  %v478_v46 = vadd.f32 %v475_v15, %v465_v32  ;;  %v482_v47 = vadd.f32 %v475_v15, %v469_v33 }
 0x16c   : > { %v466_v49 = vadd.f32 %v458_v34, %v445_v13  ;;  %v470_v48 = vadd.f32 %v462_v35, %v449_v14  ;;  %v729_v50 = vmul.f32 -1.442695, %v477_v36  ;;  %v733_v51 = vmul.f32 -1.442695, %v481_v37 }
 0x16d   : > { %v467_v52 = vadd.f32 %v459_v38, %v446_v20  ;;  %v471_v54 = vadd.f32 %v463_v39, %v450_v21  ;;  %v730_v55 = vmul.f32 -1.442695, %v478_v46  ;;  %v734_v57 = vmul.f32 -1.442695, %v482_v47 }
 0x16e   : > { %v479_v58 = vadd.f32 %v475_v15, %v466_v49  ;;  %v483_v53 = vadd.f32 %v475_v15, %v470_v48  ;;  %887 = vpow2.f32 %v729_v50 }
 0x16f   : > { %v480_v59 = vadd.f32 %v475_v15, %v467_v52  ;;  %v484_v60 = vadd.f32 %v475_v15, %v471_v54  ;;  %889 = vpow2.f32 %v730_v55 }
 0x170   : > { %v731_v61 = vmul.f32 -1.442695, %v479_v58  ;;  %891 = vpow2.f32 %v733_v51  ;;  %v735_v62 = vmul.f32 -1.442695, %v483_v53 }
 0x171   : > { %v732_v56 = vmul.f32 -1.442695, %v480_v59  ;;  %893 = vpow2.f32 %v734_v57  ;;  %v736_v63 = vmul.f32 -1.442695, %v484_v60 }
 0x172   : > { %895 = vpow2.f32 %v731_v61 }
 0x173   : > { %897 = vpow2.f32 %v732_v56 }
 0x174   : > { %899 = vpow2.f32 %v735_v62 }
 0x175   : > { %901 = vpow2.f32 %v736_v63 }
 0x178   : > { %v888_v0 = vpop.eup %887 }
 0x179   : > { %v890_v1 = vpop.eup %889  ;;  %v509_v2 = vadd.f32 1.0, %v888_v0 }
 0x17a   : > { %v892_v3 = vpop.eup %891  ;;  %v510_v4 = vadd.f32 1.0, %v890_v1 }
 0x17b   : > { %v894_v5 = vpop.eup %893  ;;  %v513_v6 = vadd.f32 1.0, %v892_v3  ;;  %903 = vrcp.f32 %v509_v2 }
 0x17c   : > { %v896_v7 = vpop.eup %895  ;;  %v514_v8 = vadd.f32 1.0, %v894_v5  ;;  %905 = vrcp.f32 %v510_v4 }
 0x17d   : > { %v898_v9 = vpop.eup %897  ;;  %v511_v10 = vadd.f32 1.0, %v896_v7  ;;  %907 = vrcp.f32 %v513_v6 }
 0x17e   : > { %v900_v11 = vpop.eup %899  ;;  %v512_v12 = vadd.f32 1.0, %v898_v9  ;;  %909 = vrcp.f32 %v514_v8 }
 0x17f   : > { %v902_v13 = vpop.eup %901  ;;  %v515_v14 = vadd.f32 1.0, %v900_v11  ;;  %911 = vrcp.f32 %v511_v10 }
 0x180   : > { %v516_v15 = vadd.f32 1.0, %v902_v13  ;;  %913 = vrcp.f32 %v512_v12 }
 0x181   : > { %915 = vrcp.f32 %v515_v14 }
 0x182   : > { %917 = vrcp.f32 %v516_v15 }
 0x185   : > { %v904_v16 = vpop.eup %903 }
 0x186   : > { %v906_v17 = vpop.eup %905  ;;  %v1334_v18 = vmul.f32 %v904_v16, %v1302_v40 }
 0x187   : > { %v908_v19 = vpop.eup %907  ;;  %v1337_v20 = vmul.f32 %v906_v17, %v1141_v24 }
 0x188   : > { %v910_v21 = vpop.eup %909  ;;  %v1340_v22 = vmul.f32 %v908_v19, %v1305_v41  ;;  %v541_v23 = vmul.f32 %v1334_v18, %v1334_v18 }
 0x189   : > { %v912_v26 = vpop.eup %911  ;;  %v1345_v27 = vmul.f32 %v910_v21, %v1144_v25  ;;  %v542_v28 = vmul.f32 %v1337_v20, %v1337_v20 }
 0x18a   : > { %v914_v40 = vpop.eup %913  ;;  %v1350_v29 = vmul.f32 %v912_v26, %v1318_v44  ;;  %v545_v24 = vmul.f32 %v1340_v22, %v1340_v22  ;;  %v549_v30 = vrot.slane %v541_v23, 4 }
 0x18b   : > { %v916_v41 = vpop.eup %915  ;;  %v1355_v31 = vmul.f32 %v914_v40, %v1308_v42  ;;  %v546_v32 = vmul.f32 %v1345_v27, %v1345_v27  ;;  %v555_v25 = vrot.slane %v542_v28, 4 }
 0x18c   : > { %v918_v33 = vpop.eup %917  ;;  %v1360_v34 = vmul.f32 %v916_v41, %v1321_v45  ;;  %v543_v44 = vmul.f32 %v1350_v29, %v1350_v29  ;;  %v550_v35 = vadd.f32 %v549_v30, %v541_v23  ;;  %v573_v36 = vrot.slane %v545_v24, 4 }
 0x18d   : > { %v1365_v37 = vmul.f32 %v918_v33, %v1311_v43  ;;  %v544_v42 = vmul.f32 %v1355_v31, %v1355_v31  ;;  %v556_v38 = vadd.f32 %v555_v25, %v542_v28  ;;  %v579_v39 = vrot.slane %v546_v32, 4 }
 0x18e   : > { %v547_v46 = vmul.f32 %v1360_v34, %v1360_v34  ;;  %v551_v47 = vrot.slane %v550_v35, 2  ;;  %v561_v49 = vrot.slane %v543_v44, 4  ;;  %v574_v45 = vadd.f32 %v573_v36, %v545_v24 }
 0x18f   : > { %v548_v48 = vmul.f32 %v1365_v37, %v1365_v37  ;;  %v557_v50 = vrot.slane %v556_v38, 2  ;;  %v567_v51 = vrot.slane %v544_v42, 4  ;;  %v580_v52 = vadd.f32 %v579_v39, %v546_v32 }
 0x190   : > { %v552_v54 = vadd.f32 %v551_v47, %v550_v35  ;;  %v562_v43 = vadd.f32 %v561_v49, %v543_v44  ;;  %v575_v55 = vrot.slane %v574_v45, 2  ;;  %v585_v57 = vrot.slane %v547_v46, 4 }
 0x191   : > { %v558_v58 = vadd.f32 %v557_v50, %v556_v38  ;;  %v568_v53 = vadd.f32 %v567_v51, %v544_v42  ;;  %v581_v59 = vrot.slane %v580_v52, 2  ;;  %v591_v60 = vrot.slane %v548_v48, 4 }
 0x192   : > { %v553_v61 = vrot.slane %v552_v54, 1  ;;  %v563_v62 = vrot.slane %v562_v43, 2  ;;  %v576_v56 = vadd.f32 %v575_v55, %v574_v45  ;;  %v586_v63 = vadd.f32 %v585_v57, %v547_v46 }
 0x193   : > { %v559_v0 = vrot.slane %v558_v58, 1  ;;  %v569_v1 = vrot.slane %v568_v53, 2  ;;  %v582_v2 = vadd.f32 %v581_v59, %v580_v52  ;;  %v592_v3 = vadd.f32 %v591_v60, %v548_v48 }
 0x194   : > { %v554_v4 = vadd.f32 %v553_v61, %v552_v54  ;;  %v564_v5 = vadd.f32 %v563_v62, %v562_v43  ;;  %v577_v6 = vrot.slane %v576_v56, 1  ;;  %v587_v7 = vrot.slane %v586_v63, 2 }
 0x195   : > { %v560_v8 = vadd.f32 %v559_v0, %v558_v58  ;;  %v570_v9 = vadd.f32 %v569_v1, %v568_v53  ;;  %v583_v10 = vrot.slane %v582_v2, 1  ;;  %v593_v11 = vrot.slane %v592_v3, 2 }
 0x196   : > { %v565_v12 = vrot.slane %v564_v5, 1  ;;  %v578_v13 = vadd.f32 %v577_v6, %v576_v56  ;;  %v588_v14 = vadd.f32 %v587_v7, %v586_v63  ;;  %v597_v15 = vmax.f32 %v554_v4, 1e-24 }
 0x197   : > { %v571_v16 = vrot.slane %v570_v9, 1  ;;  %v584_v17 = vadd.f32 %v583_v10, %v582_v2  ;;  %v594_v19 = vadd.f32 %v593_v11, %v592_v3  ;;  %v598_v21 = vmax.f32 %v560_v8, 1e-24 }
 0x198   : > { %v566_v23 = vadd.f32 %v565_v12, %v564_v5  ;;  %v589_v26 = vrot.slane %v588_v14, 1  ;;  %v601_v28 = vmax.f32 %v578_v13, 1e-24  ;;  %919 = vrsqrt.f32 %v597_v15 }
 0x199   : > { %v572_v40 = vadd.f32 %v571_v16, %v570_v9  ;;  %v595_v24 = vrot.slane %v594_v19, 1  ;;  %v602_v30 = vmax.f32 %v584_v17, 1e-24  ;;  %921 = vrsqrt.f32 %v598_v21 }
 0x19a   : > { %v590_v41 = vadd.f32 %v589_v26, %v588_v14  ;;  %v599_v32 = vmax.f32 %v566_v23, 1e-24  ;;  %923 = vrsqrt.f32 %v601_v28 }
 0x19b   : > { %v596_v25 = vadd.f32 %v595_v24, %v594_v19  ;;  %v600_v33 = vmax.f32 %v572_v40, 1e-24  ;;  %925 = vrsqrt.f32 %v602_v30 }
 0x19c   : > { %v603_v44 = vmax.f32 %v590_v41, 1e-24  ;;  %927 = vrsqrt.f32 %v599_v32 }
 0x19d   : > { %v604_v35 = vmax.f32 %v596_v25, 1e-24  ;;  %929 = vrsqrt.f32 %v600_v33 }
 0x19e   : > { %931 = vrsqrt.f32 %v603_v44 }
 0x19f   : > { %933 = vrsqrt.f32 %v604_v35 }
 0x1a2   : > { %v920_v36 = vpop.eup %919 }
 0x1a3   : > { %v922_v42 = vpop.eup %921  ;;  %v613_v38 = vmul.f32 %v920_v36, %v1334_v18 }
 0x1a4   : > { %v924_v39 = vpop.eup %923  ;;  %v614_v46 = vmul.f32 %v922_v42, %v1337_v20 }
 0x1a5   : > { %v926_v47 = vpop.eup %925  ;;  %v617_v49 = vmul.f32 %v924_v39, %v1340_v22  ;;  %621 = vst [vmem:[%s238_s6] sm:$0xff] %v613_v38 }
 0x1a6   : > { %v928_v45 = vpop.eup %927  ;;  %v618_v48 = vmul.f32 %v926_v47, %v1345_v27  ;;  %622 = vst [vmem:[%s238_s6 + $0x8] sm:$0xff] %v614_v46 }
 0x1a7   : > { %v930_v50 = vpop.eup %929  ;;  %v615_v51 = vmul.f32 %v928_v45, %v1350_v29  ;;  %625 = vst [vmem:[%s238_s6 + $0x20] sm:$0xff] %v617_v49 }
 0x1a8   : > { %v932_v18 = vpop.eup %931  ;;  %v616_v20 = vmul.f32 %v930_v50, %v1355_v31  ;;  %626 = vst [vmem:[%s238_s6 + $0x28] sm:$0xff] %v618_v48 }
 0x1a9   : > { %v934_v52 = vpop.eup %933  ;;  %v619_v22 = vmul.f32 %v932_v18, %v1360_v34  ;;  %623 = vst [vmem:[%s238_s6 + $0x10] sm:$0xff] %v615_v51 }
 0x1aa   : > { %v620_v27 = vmul.f32 %v934_v52, %v1365_v37  ;;  %624 = vst [vmem:[%s238_s6 + $0x18] sm:$0xff] %v616_v20 }
 0x1ab   : > { %627 = vst [vmem:[%s238_s6 + $0x30] sm:$0xff] %v619_v22 }
 0x1ac   : > { %628 = vst [vmem:[%s238_s6 + $0x38] sm:$0xff] %v620_v27 }
 0x1ad   : > { %948 = shalt.err (!%p945_p3)
}
 0x1ae   : > { %s949_s10 = scalar_lea.hbm %s1387_s26, 1024  ;;  %s953_s13 = scalar_lea.hbm %s1440_s5, 2048 }
 0x1af   : > { %p950_p4 = scmp.ne.s32.totalorder %s1387_s26, %s949_s10  ;;  %p954_p9 = scmp.lt.u32.totalorder %s1387_s26, %s1440_s5 }
 0x1b0   : > { %p955_p10 = scmp.lt.u32.totalorder %s953_s13, %s949_s10  ;;  %p957_p12 = scmp.lt.u32.totalorder %s949_s10, %s1387_s26 }
 0x1b1   : > { %p951_p7 = pnand %p950_p4, %p1071_p5 }
 0x1b2   : > { %p956_p11 = por %p955_p10, %p954_p9 }
 0x1b3   : > { %p952_p8 = pneg %p951_p7 }
 0x1b4   : > { %p958_p13 = por %p957_p12, %p956_p11 }
 0x1b6   : > { %p959_p0 = pnand %p958_p13, %p952_p8 }
 0x1b8   : > { %962 = shalt.err (!%p959_p0)
}
 0x1b9   : > { %s1001_s6 = smov 256   ;;  %s1002_s14 = smov 16  }
 0x1ba   : > { %843 = dma.vmem_to_hbm [thread:$0]  (%p1071_p5), %s1389_s15, 1024, %s1387_s26, %s1394_s22, %s1001_s6, %s1001_s6, %s1002_s14  }
 0x1bb PF: > { %p849_p1 = scmp.ge.s32.totalorder %s997_s21, 2  ;;  %s659_s16 = sand.u32 1, %s985_s18  }
 0x1bc   : > { %s660_s23 = scalar_lea.sflag [#allocation3], %s659_s16 }
 0x1bd   : > { %p846_p2 = pnand %p849_p1, %p1075_p6 }
 0x1bf   : > { %980 = dma.done.wait (!%p846_p2), %s660_s23, 1024  }
 0x1c0   : > { %982 = vsyncadd (!%p846_p2), %s660_s23, 4294966272  ;;  %p15_p3 = scmp.ge.s32.totalorder %s1058_s24, 4   ;;  %s1443_s18 = smov %s989_s19 }
 0x1c1   : > { %s1444_s19 = smov %s993_s20  ;;  %s1445_s20 = smov %s1069_s27 }
 0x1c2   : > { %s1446_s21 = smov %s1058_s24  ;;  %17 = sbr.rel (!%p15_p3) target bundleno = 3 (0x3), region = 78 }
 0x1c9   :  { %665 = vsyncpa [#allocation3], 1 }
 0x1ca   :  { %667 = vsyncpa [#allocation3 + $0x1], 1 }

</bundles_post_ra>
